<compile_context>
chip_gen: v6e
topology: v6e:2x2x1
jax: 0.10.0
libtpu: 0.0.40
codegen_flags: <defaults>
</compile_context>

<pallas_src>
import math
import functools

import numpy as np
import jax
import jax.numpy as jnp
from jax.experimental import pallas as pl
from jax.experimental.pallas import tpu as pltpu

LANE = 128  # lane alignment for the packed tap / output slabs


def _pad_up(x, m=LANE):
    return ((x + m - 1) // m) * m


# ----------------------------------------------------------------------------
# Fused whole-pyramid kernel (one batch element per grid step).
# Per-batch layout: channels on sublanes, time on lanes.
# ----------------------------------------------------------------------------
def _msa_fused_kernel(up_ref, taps_ref, w_main_ref, w_psi_ref, slab_ref, out_ref,
                      *, C, n_levels, pair_tu, tap_off, out_off, scaler, eps):
    """
    up_ref    : (C, T_top)  f32   coarsest level, natural time order
    taps_ref  : (3C, W_t)   f32   per-pair stride-2 taps [d_l; d_c; d_r] of the
                                  `down` level, lanes tap_off[j] .. +pair_tu[j],
                                  columns already in the pair's up-time order
    w_main_ref: (4C, C)     bf16  rows [phi_w; q_w; v_w; k_w]
    w_psi_ref : (C, 3C)     bf16  psi_2 (k=3,s=2,p=1) pre-composed with psi_1, taps [l|c|r]
    slab_ref  : (2C, 3+n)   f32   col0=[v_b;k_b]  col1=[phi_b;q_b]
                                  col2=[psi_b_main;psi_b_left]  col 3+l=[ln_gamma_l;ln_beta_l]
    out_ref   : (C, W_out)  f32   level l occupies lanes out_off[l] .. +T_l
    """
    f32, bf16 = jnp.float32, jnp.bfloat16

    # constant operands: loaded once, hoisted out of the (unrolled) pair loop
    w_pq = w_main_ref[0:2 * C, :]             # bf16 (2C, C)  [phi_w; q_w]
    w_vk = w_main_ref[2 * C:4 * C, :]         # bf16 (2C, C)  [v_w; k_w]
    w_psi = w_psi_ref[...]                    # bf16 (C, 3C)
    slab = slab_ref[...]                      # f32  (2C, 3+n)
    vk_b = slab[:, 0:1]
    pq_b = slab[:, 1:2]
    q_b = slab[C:2 * C, 1:2]
    psi_b_main = slab[0:C, 2:3]
    psi_b_left = slab[C:2 * C, 2:3]
    inv_scale = 1.0 / scaler

    def mm(a, b):                              # MXU, bf16 operands, f32 accumulation
        return jnp.dot(a, b, preferred_element_type=f32)

    def mm_nt(a, b):                           # a @ b.T, no materialized transpose
        return jax.lax.dot_general(a, b, (((1,), (1,)), ((), ())),
                                   preferred_element_type=f32)

    def softmax_rows(logits):                  # f32 softmax, EUP reciprocal
        m = jnp.max(logits, axis=-1, keepdims=True)
        e = jnp.exp(logits - m)
        return e * pl.reciprocal(jnp.sum(e, axis=-1, keepdims=True), approx=True)

    def layer_norm(x, lvl):                    # LN over channel (sublane) axis, f32
        g = slab[0:C, 3 + lvl:4 + lvl]
        b = slab[C:2 * C, 3 + lvl:4 + lvl]
        mu = jnp.mean(x, axis=0, keepdims=True)
        var = jnp.mean(jnp.square(x - mu), axis=0, keepdims=True)
        return (x - mu) * jax.lax.rsqrt(var + eps) * g + b

    up = up_ref[...]                           # (C, T_top) f32, natural order

    # Python-unrolled over the static level pairs: i = n-1 ... 1
    for j, i in enumerate(range(n_levels - 1, 0, -1)):
        tu = pair_tu[j]
        toff = tap_off[j]
        taps = taps_ref[:, toff:toff + tu]                     # (3C, tu) f32
        d_l, d_c, d_r = taps[0:C], taps[C:2 * C], taps[2 * C:3 * C]

        # NOTE: the block always covers the whole (permuted) time axis of the
        # level, and natural t==0 is always column 0, so the boundary handling
        # below stays valid.  (Would need a global column index if time tiling
        # were ever added.)
        col = jax.lax.broadcasted_iota(jnp.int32, (C, tu), 1)
        is_first = col == 0

        # ---- down2up = maxpool(down) + psi_2(psi_1(down))  (pre-composed psi) ----
        mp = jnp.maximum(jnp.maximum(d_c, d_r), jnp.where(is_first, d_c, d_l))
        conv = mm(w_psi, taps.astype(bf16))                    # one MXU call
        conv = conv + psi_b_main + jnp.where(is_first, 0.0, psi_b_left)
        down2up = mp + conv                                    # (C, tu) f32

        # ---- projections: 3 wide MXU calls instead of 8 small ones ---------------
        # (a) [phi_w; q_w] @ [up | d_c + d_r]
        o1 = mm(w_pq, jnp.concatenate([up, d_c + d_r], axis=-1).astype(bf16)) + pq_b
        phi_up = o1[0:C, 0:tu]                                 # phi(up) (+phi_b)
        q_u = o1[C:2 * C, 0:tu].astype(bf16)                   # q(up)
        qd_fold = (o1[C:2 * C, tu:2 * tu] + q_b).astype(bf16)  # q(d[2t]) + q(d[2t+1])
        y = up + phi_up                                        # up + phi(up), f32
        # (b) composed-psi conv is the matmul above
        # (c) [v_w; k_w] @ [y | down2up]
        o3 = mm(w_vk, jnp.concatenate([y, down2up], axis=-1).astype(bf16)) + vk_b
        v_y = o3[0:C, 0:tu].astype(bf16)
        v_d2u = o3[0:C, tu:2 * tu].astype(bf16)
        k_y = o3[C:2 * C, 0:tu].astype(bf16)
        k_d2u = o3[C:2 * C, tu:2 * tu].astype(bf16)

        # ---- channel attention (C x C); 2x nearest-upsample folded away ----------
        attn_d2u = softmax_rows(mm_nt(q_u, k_d2u) * inv_scale)
        attn_u2d = softmax_rows(mm_nt(qd_fold, k_y) * inv_scale)
        up_out = up + mm(attn_d2u.astype(bf16), v_d2u)         # (C, tu)
        z = mm(attn_u2d.astype(bf16), v_y)                     # (C, tu)

        # ---- finalize level i: fused channel LayerNorm, lane-dense store ---------
        out_ref[:, out_off[i]:out_off[i] + tu] = layer_norm(up_out, i)

        # ---- level i-1 state, kept in "even|odd" deinterleaved lane order --------
        nxt = jnp.concatenate([d_c + z, d_r + z], axis=-1)     # (C, 2*tu)
        if i == 1:
            out_ref[:, out_off[0]:out_off[0] + 2 * tu] = layer_norm(nxt, 0)
        else:
            up = nxt                                           # stays in VMEM


# ----------------------------------------------------------------------------
# Parameter / operand preparation (plain JAX glue, runs once)
# ----------------------------------------------------------------------------
def _prepare_operands(params, n_levels):
    p = params["cla"]
    C = p["phi_w"].shape[0]
    bf = lambda x: x.astype(jnp.bfloat16)
    # pre-compose psi_2 (k=3, stride=2, pad=1) with the pointwise psi_1
    wl = p["psi2_w"][0] @ p["psi1_w"]
    wc = p["psi2_w"][1] @ p["psi1_w"]
    wr = p["psi2_w"][2] @ p["psi1_w"]
    bl = p["psi2_w"][0] @ p["psi1_b"]
    bc = p["psi2_w"][1] @ p["psi1_b"]
    br = p["psi2_w"][2] @ p["psi1_b"]

    w_main = bf(jnp.concatenate([p["phi_w"], p["q_w"], p["vk_w"]], axis=0))   # (4C, C)
    w_psi = bf(jnp.concatenate([wl, wc, wr], axis=1))                         # (C, 3C)
    ln_cols = [jnp.concatenate([params["ln_gamma"][l].reshape(C, 1),
                                params["ln_beta"][l].reshape(C, 1)], axis=0)
               for l in range(n_levels)]
    slab = jnp.concatenate(
        [p["vk_b"],
         jnp.concatenate([p["phi_b"], p["q_b"]], axis=0),
         jnp.concatenate([bc + br + p["psi2_b"], bl], axis=0)] + ln_cols,
        axis=1).astype(jnp.float32)                                           # (2C, 3+n)
    return w_main, w_psi, slab


def _level_perms(Ts):
    """Static column order of each level's state as held inside the kernel."""
    n = len(Ts)
    perms = [None] * n
    perms[n - 1] = np.arange(Ts[n - 1])
    for i in range(n - 1, 0, -1):
        perms[i - 1] = np.concatenate([2 * perms[i], 2 * perms[i] + 1])
    return perms


# ----------------------------------------------------------------------------
# MSANeck forward
# ----------------------------------------------------------------------------
def msa_neck_forward(inputs, fpn_masks, params, start_level=0):
    n = len(params["ln_gamma"])
    # TODO(synk): degenerate num_levels == 1 (LayerNorm-only) path not implemented.
    assert n >= 2
    xs = [inputs[start_level + l] for l in range(n)]
    B, C, _ = xs[0].shape
    Ts = [int(x.shape[-1]) for x in xs]
    for l in range(1, n):
        # TODO(synk): only the exact scale_factor==2 pyramid (Td == 2*Tu) is handled.
        assert Ts[l - 1] == 2 * Ts[l], "pyramid lengths must halve exactly per level"

    perms = _level_perms(Ts)
    w_main, w_psi, slab = _prepare_operands(params, n)

    # pack the stride-2 taps of every `down` level, pre-permuted to the
    # (deinterleaved) up-time order of the pair that consumes them
    pair_tu, tap_off, tap_blocks, off = [], [], [], 0
    for i in range(n - 1, 0, -1):
        tu = Ts[i]
        idx_c = 2 * perms[i]
        down = xs[i - 1]                                    # original level i-1
        d_c = down[:, :, idx_c]
        d_r = down[:, :, idx_c + 1]
        d_l = down[:, :, np.maximum(idx_c - 1, 0)]
        d_l = d_l.at[:, :, 0].set(0.0)                      # conv zero-pad at natural t==0
        blk = jnp.concatenate([d_l, d_c, d_r], axis=1)      # (B, 3C, tu)
        w = _pad_up(tu)
        blk = jnp.pad(blk, ((0, 0), (0, 0), (0, w - tu)))
        pair_tu.append(tu)
        tap_off.append(off)
        tap_blocks.append(blk)
        off += w
    taps_all = jnp.concatenate(tap_blocks, axis=-1)         # (B, 3C, W_taps)
    w_taps = off

    out_off, off = [], 0
    for l in range(n):
        out_off.append(off)
        off += _pad_up(Ts[l])
    w_out = off

    kernel = functools.partial(
        _msa_fused_kernel, C=C, n_levels=n, pair_tu=tuple(pair_tu),
        tap_off=tuple(tap_off), out_off=tuple(out_off),
        scaler=math.sqrt(C), eps=1e-6)

    def bspec(shape):            # per-batch block, batch dim squeezed
        nd = len(shape)
        return pl.BlockSpec((None,) + shape, lambda b: (b,) + (0,) * nd)

    def wspec(shape):            # whole (constant) array, same block every step
        nd = len(shape)
        return pl.BlockSpec(shape, lambda b: (0,) * nd)

    out_all = pl.pallas_call(
        kernel,
        grid=(B,),
        in_specs=[bspec((C, Ts[n - 1])),                 # coarsest level
                  bspec((3 * C, w_taps)),                # packed taps, all pairs
                  wspec((4 * C, C)),                     # [phi;q;v;k] weights (bf16)
                  wspec((C, 3 * C)),                     # composed psi (bf16)
                  wspec((2 * C, 3 + n))],                # biases + LayerNorm params
        out_specs=bspec((C, w_out)),                     # single lane-dense output slab
        out_shape=jax.ShapeDtypeStruct((B, C, w_out), jnp.float32),
        compiler_params=pltpu.CompilerParams(
            dimension_semantics=("parallel",),           # batch across v7x TensorCores
            # demo needs far less; re-budget for production T (raise on v5e/v6e's
            # 128 MiB, shrink / time-tile on v7x's 64 MiB)
            vmem_limit_bytes=32 * 1024 * 1024),
    )(xs[n - 1], taps_all, w_main, w_psi, slab)

    # undo the static deinterleave permutation of each level (one gather each)
    feats = []
    for l in range(n):
        inv = np.argsort(perms[l])
        feats.append(out_all[:, :, np.asarray(out_off[l] + inv, dtype=np.int32)])
    masks = tuple(fpn_masks[start_level + l] for l in range(n))
    return tuple(feats), masks


# ----------------------------------------------------------------------------
# Deterministic parameter init (Conv1d-like uniform; LN = ones/zeros)
# ----------------------------------------------------------------------------
def init_params(key, C, num_levels):
    ks = jax.random.split(key, 12)

    def u(k, shape, fan_in):
        bound = 1.0 / math.sqrt(fan_in)
        return jax.random.uniform(k, shape, jnp.float32, -bound, bound)

    cla = {
        "phi_w": u(ks[0], (C, C), C),         "phi_b": u(ks[1], (C, 1), C),
        "psi1_w": u(ks[2], (C, C), C),        "psi1_b": u(ks[3], (C, 1), C),
        # psi_2 is Conv1d(C, C, k=3): stored tap-major (3, C, C)
        "psi2_w": u(ks[4], (3, C, C), 3 * C), "psi2_b": u(ks[5], (C, 1), 3 * C),
        "vk_w": u(ks[6], (2 * C, C), C),      "vk_b": u(ks[7], (2 * C, 1), C),
        "q_w": u(ks[8], (C, C), C),           "q_b": u(ks[9], (C, 1), C),
    }
    return {
        "cla": cla,
        "ln_gamma": [jnp.ones((C,), jnp.float32) for _ in range(num_levels)],
        "ln_beta": [jnp.zeros((C,), jnp.float32) for _ in range(num_levels)],
    }


# ----------------------------------------------------------------------------
# Pure-JAX f32 reference (mirrors the PyTorch module, no restructuring)
# ----------------------------------------------------------------------------
def _cla_ref(up, down, p):
    B, C, Tu = up.shape
    Td = down.shape[-1]
    scaler = math.sqrt(C)

    def conv1(w, b, x):  # Conv1d k=1 on (B, Ci, T)
        return jnp.einsum("oc,bct->bot", w, x) + b[None, :, :]

    # up2down = interpolate(up + phi(up), size=Td, mode='nearest')
    y = up + conv1(p["phi_w"], p["phi_b"], up)
    src = (jnp.arange(Td) * Tu) // Td
    up2down = y[:, :, src]

    # down2up = maxpool(down) + psi_2(psi_1(down))
    n_out = (Td - 1) // 2 + 1
    p1 = conv1(p["psi1_w"], p["psi1_b"], down)
    p1p = jnp.pad(p1, ((0, 0), (0, 0), (1, 1)))
    psi2 = sum(jnp.einsum("oc,bct->bot", p["psi2_w"][k],
                          p1p[:, :, k:k + 2 * n_out:2]) for k in range(3))
    psi2 = psi2 + p["psi2_b"][None, :, :]
    dpad = jnp.pad(down, ((0, 0), (0, 0), (1, 1)), constant_values=-jnp.inf)
    mp = jnp.max(jnp.stack([dpad[:, :, k:k + 2 * n_out:2] for k in range(3)], 0), 0)
    down2up = mp + psi2

    vk_u2d = conv1(p["vk_w"], p["vk_b"], up2down)
    vk_d2u = conv1(p["vk_w"], p["vk_b"], down2up)
    v_u2d, k_u2d = vk_u2d[:, :C], vk_u2d[:, C:]
    v_d2u, k_d2u = vk_d2u[:, :C], vk_d2u[:, C:]
    q_u = conv1(p["q_w"], p["q_b"], up)
    q_d = conv1(p["q_w"], p["q_b"], down)
    attn_d2u = jax.nn.softmax(jnp.einsum("bct,bdt->bcd", q_u, k_d2u) / scaler, -1)
    attn_u2d = jax.nn.softmax(jnp.einsum("bct,bdt->bcd", q_d, k_u2d) / scaler, -1)
    return (up + jnp.einsum("bcd,bdt->bct", attn_d2u, v_d2u),
            down + jnp.einsum("bcd,bdt->bct", attn_u2d, v_u2d))


def _msa_ref(inputs, params):
    ag = list(inputs)
    n = len(params["ln_gamma"])
    for i in range(n - 1, 0, -1):
        ag[i], ag[i - 1] = _cla_ref(ag[i], ag[i - 1], params["cla"])
    outs = []
    for i in range(n):
        x = ag[i]
        mu = jnp.mean(x, axis=1, keepdims=True)
        var = jnp.mean((x - mu) ** 2, axis=1, keepdims=True)
        g = params["ln_gamma"][i][None, :, None]
        b = params["ln_beta"][i][None, :, None]
        outs.append((x - mu) / jnp.sqrt(var + 1e-6) * g + b)
    return outs


# ----------------------------------------------------------------------------
if __name__ == "__main__":
    B, C = 2, 32
    num_levels = 3
    Ts = [16, 8, 4]          # temporal pyramid, scale_factor = 2

    key = jax.random.PRNGKey(0)
    k_in, k_par = jax.random.split(key)
    inputs = [jax.random.normal(jax.random.fold_in(k_in, i), (B, C, Ts[i]),
                                jnp.float32) for i in range(num_levels)]
    fpn_masks = [jnp.ones((B, Ts[i]), jnp.bool_) for i in range(num_levels)]
    params = init_params(k_par, C, num_levels)

    feats, masks = msa_neck_forward(inputs, fpn_masks, params)
    for f in feats:
        jax.block_until_ready(f)

    # sanity check against a pure-JAX f32 reference (kernel uses bf16 MXU inputs)
    refs = _msa_ref(inputs, params)
    for f, r in zip(feats, refs):
        err = jnp.max(jnp.abs(f - r))
        assert jnp.allclose(f, r, atol=3e-2, rtol=3e-2), f"mismatch: max|err|={err}"

    print("KERNEL_OK")
</pallas_src>

<mosaic_0001>
module attributes {stable_mosaic.version = 11 : i64} {
  func.func @_msa_fused_kernel(%arg0: i32, %arg1: memref<1x32x4xf32, #tpu.memory_space<vmem>>, %arg2: memref<1x96x256xf32, #tpu.memory_space<vmem>>, %arg3: memref<128x32xbf16, #tpu.memory_space<vmem>>, %arg4: memref<32x96xbf16, #tpu.memory_space<vmem>>, %arg5: memref<64x6xf32, #tpu.memory_space<vmem>>, %arg6: memref<1x32x384xf32, #tpu.memory_space<vmem>>) attributes {dimension_semantics = [#tpu.dimension_semantics<parallel>], iteration_bounds = array<i64: 2>, scalar_prefetch = 0 : i64, scratch_operands = 0 : i64, tpu.core_type = #tpu.core_type<tc>, window_params = [{transform_indices = @transform_0, window_bounds = array<i64: 1, 32, 4>}, {transform_indices = @transform_1, window_bounds = array<i64: 1, 96, 256>}, {pipeline_mode = #tpu.pipeline_mode<synchronous>, transform_indices = @transform_2, window_bounds = array<i64: 128, 32>}, {pipeline_mode = #tpu.pipeline_mode<synchronous>, transform_indices = @transform_3, window_bounds = array<i64: 32, 96>}, {pipeline_mode = #tpu.pipeline_mode<synchronous>, transform_indices = @transform_4, window_bounds = array<i64: 64, 6>}, {transform_indices = @transform_5, window_bounds = array<i64: 1, 32, 384>}]} {
    %c0 = arith.constant 0 : index
    %c0_0 = arith.constant 0 : index
    %0 = vector.load %arg3[%c0, %c0_0] : memref<128x32xbf16, #tpu.memory_space<vmem>>, vector<64x32xbf16>
    %c64 = arith.constant 64 : index
    %c0_1 = arith.constant 0 : index
    %1 = vector.load %arg3[%c64, %c0_1] : memref<128x32xbf16, #tpu.memory_space<vmem>>, vector<64x32xbf16>
    %c0_2 = arith.constant 0 : index
    %c0_3 = arith.constant 0 : index
    %2 = vector.load %arg4[%c0_2, %c0_3] : memref<32x96xbf16, #tpu.memory_space<vmem>>, vector<32x96xbf16>
    %c0_4 = arith.constant 0 : index
    %c0_5 = arith.constant 0 : index
    %3 = vector.load %arg5[%c0_4, %c0_5] : memref<64x6xf32, #tpu.memory_space<vmem>>, vector<64x6xf32>
    %4 = vector.extract_strided_slice %3 {offsets = [0, 0], sizes = [64, 1], strides = [1, 1]} : vector<64x6xf32> to vector<64x1xf32>
    %5 = vector.extract_strided_slice %3 {offsets = [0, 1], sizes = [64, 1], strides = [1, 1]} : vector<64x6xf32> to vector<64x1xf32>
    %6 = vector.extract_strided_slice %3 {offsets = [32, 1], sizes = [32, 1], strides = [1, 1]} : vector<64x6xf32> to vector<32x1xf32>
    %7 = vector.extract_strided_slice %3 {offsets = [0, 2], sizes = [32, 1], strides = [1, 1]} : vector<64x6xf32> to vector<32x1xf32>
    %8 = vector.extract_strided_slice %3 {offsets = [32, 2], sizes = [32, 1], strides = [1, 1]} : vector<64x6xf32> to vector<32x1xf32>
    %c0_6 = arith.constant 0 : index
    %c0_7 = arith.constant 0 : index
    %c0_8 = arith.constant 0 : index
    %9 = vector.load %arg1[%c0_6, %c0_7, %c0_8] : memref<1x32x4xf32, #tpu.memory_space<vmem>>, vector<1x32x4xf32>
    %10 = vector.shape_cast %9 : vector<1x32x4xf32> to vector<32x4xf32>
    %c0_9 = arith.constant 0 : index
    %c0_10 = arith.constant 0 : index
    %c0_11 = arith.constant 0 : index
    %11 = vector.load %arg2[%c0_9, %c0_10, %c0_11] : memref<1x96x256xf32, #tpu.memory_space<vmem>>, vector<1x96x4xf32>
    %12 = vector.shape_cast %11 : vector<1x96x4xf32> to vector<96x4xf32>
    %13 = vector.extract_strided_slice %12 {offsets = [0, 0], sizes = [32, 4], strides = [1, 1]} : vector<96x4xf32> to vector<32x4xf32>
    %14 = vector.extract_strided_slice %12 {offsets = [32, 0], sizes = [32, 4], strides = [1, 1]} : vector<96x4xf32> to vector<32x4xf32>
    %15 = vector.extract_strided_slice %12 {offsets = [64, 0], sizes = [32, 4], strides = [1, 1]} : vector<96x4xf32> to vector<32x4xf32>
    %16 = tpu.iota {dimensions = array<i32: 1>} : vector<32x4xi32>
    %c0_i32 = arith.constant 0 : i32
    %17 = vector.broadcast %c0_i32 : i32 to vector<32x4xi32>
    %18 = arith.cmpi eq, %16, %17 : vector<32x4xi32>
    %19 = arith.maximumf %14, %15 : vector<32x4xf32>
    %20 = arith.select %18, %14, %13 : vector<32x4xi1>, vector<32x4xf32>
    %21 = arith.maximumf %19, %20 : vector<32x4xf32>
    %22 = arith.truncf %12 : vector<96x4xf32> to vector<96x4xbf16>
    %cst = arith.constant dense<0.000000e+00> : vector<32x4xf32>
    %23 = tpu.matmul %2, %22, %cst {dimension_numbers = #tpu.dot_dimension_numbers<[1], [0], [0], [1], [0, 0, 1, 1], [], []>} : vector<32x96xbf16>, vector<96x4xbf16>, vector<32x4xf32> -> vector<32x4xf32>
    %24 = vector.broadcast %7 : vector<32x1xf32> to vector<32x4xf32>
    %25 = arith.addf %23, %24 : vector<32x4xf32>
    %cst_12 = arith.constant 0.000000e+00 : f32
    %26 = vector.broadcast %cst_12 : f32 to vector<32x4xf32>
    %27 = vector.shape_cast %8 : vector<32x1xf32> to vector<32x1xf32>
    %28 = vector.broadcast %27 : vector<32x1xf32> to vector<32x4xf32>
    %29 = arith.select %18, %26, %28 : vector<32x4xi1>, vector<32x4xf32>
    %30 = arith.addf %25, %29 : vector<32x4xf32>
    %31 = arith.addf %21, %30 : vector<32x4xf32>
    %32 = arith.addf %14, %15 : vector<32x4xf32>
    %33 = tpu.concatenate %10, %32 in 1 : vector<32x4xf32>, vector<32x4xf32> -> vector<32x8xf32>
    %34 = arith.truncf %33 : vector<32x8xf32> to vector<32x8xbf16>
    %cst_13 = arith.constant dense<0.000000e+00> : vector<64x8xf32>
    %35 = tpu.matmul %0, %34, %cst_13 {dimension_numbers = #tpu.dot_dimension_numbers<[1], [0], [0], [1], [0, 0, 1, 1], [], []>} : vector<64x32xbf16>, vector<32x8xbf16>, vector<64x8xf32> -> vector<64x8xf32>
    %36 = vector.broadcast %5 : vector<64x1xf32> to vector<64x8xf32>
    %37 = arith.addf %35, %36 : vector<64x8xf32>
    %38 = vector.extract_strided_slice %37 {offsets = [0, 0], sizes = [32, 4], strides = [1, 1]} : vector<64x8xf32> to vector<32x4xf32>
    %39 = vector.extract_strided_slice %37 {offsets = [32, 0], sizes = [32, 4], strides = [1, 1]} : vector<64x8xf32> to vector<32x4xf32>
    %40 = arith.truncf %39 : vector<32x4xf32> to vector<32x4xbf16>
    %41 = vector.extract_strided_slice %37 {offsets = [32, 4], sizes = [32, 4], strides = [1, 1]} : vector<64x8xf32> to vector<32x4xf32>
    %42 = vector.broadcast %6 : vector<32x1xf32> to vector<32x4xf32>
    %43 = arith.addf %41, %42 : vector<32x4xf32>
    %44 = arith.truncf %43 : vector<32x4xf32> to vector<32x4xbf16>
    %45 = arith.addf %10, %38 : vector<32x4xf32>
    %46 = tpu.concatenate %45, %31 in 1 : vector<32x4xf32>, vector<32x4xf32> -> vector<32x8xf32>
    %47 = arith.truncf %46 : vector<32x8xf32> to vector<32x8xbf16>
    %cst_14 = arith.constant dense<0.000000e+00> : vector<64x8xf32>
    %48 = tpu.matmul %1, %47, %cst_14 {dimension_numbers = #tpu.dot_dimension_numbers<[1], [0], [0], [1], [0, 0, 1, 1], [], []>} : vector<64x32xbf16>, vector<32x8xbf16>, vector<64x8xf32> -> vector<64x8xf32>
    %49 = vector.broadcast %4 : vector<64x1xf32> to vector<64x8xf32>
    %50 = arith.addf %48, %49 : vector<64x8xf32>
    %51 = vector.extract_strided_slice %50 {offsets = [0, 0], sizes = [32, 4], strides = [1, 1]} : vector<64x8xf32> to vector<32x4xf32>
    %52 = arith.truncf %51 : vector<32x4xf32> to vector<32x4xbf16>
    %53 = vector.extract_strided_slice %50 {offsets = [0, 4], sizes = [32, 4], strides = [1, 1]} : vector<64x8xf32> to vector<32x4xf32>
    %54 = arith.truncf %53 : vector<32x4xf32> to vector<32x4xbf16>
    %55 = vector.extract_strided_slice %50 {offsets = [32, 0], sizes = [32, 4], strides = [1, 1]} : vector<64x8xf32> to vector<32x4xf32>
    %56 = arith.truncf %55 : vector<32x4xf32> to vector<32x4xbf16>
    %57 = vector.extract_strided_slice %50 {offsets = [32, 4], sizes = [32, 4], strides = [1, 1]} : vector<64x8xf32> to vector<32x4xf32>
    %58 = arith.truncf %57 : vector<32x4xf32> to vector<32x4xbf16>
    %cst_15 = arith.constant dense<0.000000e+00> : vector<32x32xf32>
    %59 = tpu.matmul %40, %58, %cst_15 {dimension_numbers = #tpu.dot_dimension_numbers<[1], [1], [0], [0], [0, 0, 1, 0], [], []>} : vector<32x4xbf16>, vector<32x4xbf16>, vector<32x32xf32> -> vector<32x32xf32>
    %cst_16 = arith.constant 0.176776692 : f32
    %60 = vector.broadcast %cst_16 : f32 to vector<32x32xf32>
    %61 = arith.mulf %59, %60 : vector<32x32xf32>
    %cst_17 = arith.constant dense<0xFF800000> : vector<32xf32>
    %62 = vector.multi_reduction <maximumf>, %61, %cst_17 [1] : vector<32x32xf32> to vector<32xf32>
    %63 = vector.shape_cast %62 : vector<32xf32> to vector<32x1xf32>
    %64 = vector.broadcast %63 : vector<32x1xf32> to vector<32x32xf32>
    %65 = arith.subf %61, %64 : vector<32x32xf32>
    %66 = math.exp %65 : vector<32x32xf32>
    %cst_18 = arith.constant dense<0.000000e+00> : vector<32xf32>
    %67 = vector.multi_reduction <add>, %66, %cst_18 [1] : vector<32x32xf32> to vector<32xf32>
    %68 = vector.shape_cast %67 : vector<32xf32> to vector<32x1xf32>
    %69 = tpu.reciprocal %68 {approx = true} : vector<32x1xf32> -> vector<32x1xf32>
    %70 = vector.broadcast %69 : vector<32x1xf32> to vector<32x32xf32>
    %71 = arith.mulf %66, %70 : vector<32x32xf32>
    %cst_19 = arith.constant dense<0.000000e+00> : vector<32x32xf32>
    %72 = tpu.matmul %44, %56, %cst_19 {dimension_numbers = #tpu.dot_dimension_numbers<[1], [1], [0], [0], [0, 0, 1, 0], [], []>} : vector<32x4xbf16>, vector<32x4xbf16>, vector<32x32xf32> -> vector<32x32xf32>
    %cst_20 = arith.constant 0.176776692 : f32
    %73 = vector.broadcast %cst_20 : f32 to vector<32x32xf32>
    %74 = arith.mulf %72, %73 : vector<32x32xf32>
    %cst_21 = arith.constant dense<0xFF800000> : vector<32xf32>
    %75 = vector.multi_reduction <maximumf>, %74, %cst_21 [1] : vector<32x32xf32> to vector<32xf32>
    %76 = vector.shape_cast %75 : vector<32xf32> to vector<32x1xf32>
    %77 = vector.broadcast %76 : vector<32x1xf32> to vector<32x32xf32>
    %78 = arith.subf %74, %77 : vector<32x32xf32>
    %79 = math.exp %78 : vector<32x32xf32>
    %cst_22 = arith.constant dense<0.000000e+00> : vector<32xf32>
    %80 = vector.multi_reduction <add>, %79, %cst_22 [1] : vector<32x32xf32> to vector<32xf32>
    %81 = vector.shape_cast %80 : vector<32xf32> to vector<32x1xf32>
    %82 = tpu.reciprocal %81 {approx = true} : vector<32x1xf32> -> vector<32x1xf32>
    %83 = vector.broadcast %82 : vector<32x1xf32> to vector<32x32xf32>
    %84 = arith.mulf %79, %83 : vector<32x32xf32>
    %85 = arith.truncf %71 : vector<32x32xf32> to vector<32x32xbf16>
    %cst_23 = arith.constant dense<0.000000e+00> : vector<32x4xf32>
    %86 = tpu.matmul %85, %54, %cst_23 {dimension_numbers = #tpu.dot_dimension_numbers<[1], [0], [0], [1], [0, 0, 1, 1], [], []>} : vector<32x32xbf16>, vector<32x4xbf16>, vector<32x4xf32> -> vector<32x4xf32>
    %87 = arith.addf %10, %86 : vector<32x4xf32>
    %88 = arith.truncf %84 : vector<32x32xf32> to vector<32x32xbf16>
    %cst_24 = arith.constant dense<0.000000e+00> : vector<32x4xf32>
    %89 = tpu.matmul %88, %52, %cst_24 {dimension_numbers = #tpu.dot_dimension_numbers<[1], [0], [0], [1], [0, 0, 1, 1], [], []>} : vector<32x32xbf16>, vector<32x4xbf16>, vector<32x4xf32> -> vector<32x4xf32>
    %90 = vector.extract_strided_slice %3 {offsets = [0, 5], sizes = [32, 1], strides = [1, 1]} : vector<64x6xf32> to vector<32x1xf32>
    %91 = vector.extract_strided_slice %3 {offsets = [32, 5], sizes = [32, 1], strides = [1, 1]} : vector<64x6xf32> to vector<32x1xf32>
    %cst_25 = arith.constant dense<0.000000e+00> : vector<4xf32>
    %92 = vector.multi_reduction <add>, %87, %cst_25 [0] : vector<32x4xf32> to vector<4xf32>
    %93 = vector.shape_cast %92 : vector<4xf32> to vector<1x4xf32>
    %cst_26 = arith.constant 3.200000e+01 : f32
    %94 = vector.broadcast %cst_26 : f32 to vector<1x4xf32>
    %95 = arith.divf %93, %94 : vector<1x4xf32>
    %96 = vector.broadcast %95 : vector<1x4xf32> to vector<32x4xf32>
    %97 = arith.subf %87, %96 : vector<32x4xf32>
    %98 = arith.mulf %97, %97 : vector<32x4xf32>
    %cst_27 = arith.constant dense<0.000000e+00> : vector<4xf32>
    %99 = vector.multi_reduction <add>, %98, %cst_27 [0] : vector<32x4xf32> to vector<4xf32>
    %100 = vector.shape_cast %99 : vector<4xf32> to vector<1x4xf32>
    %cst_28 = arith.constant 3.200000e+01 : f32
    %101 = vector.broadcast %cst_28 : f32 to vector<1x4xf32>
    %102 = arith.divf %100, %101 : vector<1x4xf32>
    %103 = vector.broadcast %95 : vector<1x4xf32> to vector<32x4xf32>
    %104 = arith.subf %87, %103 : vector<32x4xf32>
    %cst_29 = arith.constant 9.99999997E-7 : f32
    %105 = vector.broadcast %cst_29 : f32 to vector<1x4xf32>
    %106 = arith.addf %102, %105 : vector<1x4xf32>
    %107 = math.rsqrt %106 : vector<1x4xf32>
    %108 = vector.broadcast %107 : vector<1x4xf32> to vector<32x4xf32>
    %109 = arith.mulf %104, %108 : vector<32x4xf32>
    %110 = vector.broadcast %90 : vector<32x1xf32> to vector<32x4xf32>
    %111 = arith.mulf %109, %110 : vector<32x4xf32>
    %112 = vector.broadcast %91 : vector<32x1xf32> to vector<32x4xf32>
    %113 = arith.addf %111, %112 : vector<32x4xf32>
    %c0_30 = arith.constant 0 : index
    %c0_31 = arith.constant 0 : index
    %c256 = arith.constant 256 : index
    %114 = vector.load %arg6[%c0_30, %c0_31, %c256] : memref<1x32x384xf32, #tpu.memory_space<vmem>>, vector<1x32x4xf32>
    %115 = vector.shape_cast %114 : vector<1x32x4xf32> to vector<32x4xf32>
    %116 = vector.shape_cast %113 : vector<32x4xf32> to vector<1x32x4xf32>
    tpu.vector_store %arg6[%c0_30, %c0_31, %c256], %116 {strides = array<i32>} : memref<1x32x384xf32, #tpu.memory_space<vmem>>, vector<1x32x4xf32>,
    %117 = arith.addf %14, %89 : vector<32x4xf32>
    %118 = arith.addf %15, %89 : vector<32x4xf32>
    %119 = tpu.concatenate %117, %118 in 1 : vector<32x4xf32>, vector<32x4xf32> -> vector<32x8xf32>
    %c0_32 = arith.constant 0 : index
    %c0_33 = arith.constant 0 : index
    %c128 = arith.constant 128 : index
    %120 = vector.load %arg2[%c0_32, %c0_33, %c128] : memref<1x96x256xf32, #tpu.memory_space<vmem>>, vector<1x96x8xf32>
    %121 = vector.shape_cast %120 : vector<1x96x8xf32> to vector<96x8xf32>
    %122 = vector.extract_strided_slice %121 {offsets = [0, 0], sizes = [32, 8], strides = [1, 1]} : vector<96x8xf32> to vector<32x8xf32>
    %123 = vector.extract_strided_slice %121 {offsets = [32, 0], sizes = [32, 8], strides = [1, 1]} : vector<96x8xf32> to vector<32x8xf32>
    %124 = vector.extract_strided_slice %121 {offsets = [64, 0], sizes = [32, 8], strides = [1, 1]} : vector<96x8xf32> to vector<32x8xf32>
    %125 = tpu.iota {dimensions = array<i32: 1>} : vector<32x8xi32>
    %c0_i32_34 = arith.constant 0 : i32
    %126 = vector.broadcast %c0_i32_34 : i32 to vector<32x8xi32>
    %127 = arith.cmpi eq, %125, %126 : vector<32x8xi32>
    %128 = arith.maximumf %123, %124 : vector<32x8xf32>
    %129 = arith.select %127, %123, %122 : vector<32x8xi1>, vector<32x8xf32>
    %130 = arith.maximumf %128, %129 : vector<32x8xf32>
    %131 = arith.truncf %121 : vector<96x8xf32> to vector<96x8xbf16>
    %cst_35 = arith.constant dense<0.000000e+00> : vector<32x8xf32>
    %132 = tpu.matmul %2, %131, %cst_35 {dimension_numbers = #tpu.dot_dimension_numbers<[1], [0], [0], [1], [0, 0, 1, 1], [], []>} : vector<32x96xbf16>, vector<96x8xbf16>, vector<32x8xf32> -> vector<32x8xf32>
    %133 = vector.broadcast %7 : vector<32x1xf32> to vector<32x8xf32>
    %134 = arith.addf %132, %133 : vector<32x8xf32>
    %cst_36 = arith.constant 0.000000e+00 : f32
    %135 = vector.broadcast %cst_36 : f32 to vector<32x8xf32>
    %136 = vector.shape_cast %8 : vector<32x1xf32> to vector<32x1xf32>
    %137 = vector.broadcast %136 : vector<32x1xf32> to vector<32x8xf32>
    %138 = arith.select %127, %135, %137 : vector<32x8xi1>, vector<32x8xf32>
    %139 = arith.addf %134, %138 : vector<32x8xf32>
    %140 = arith.addf %130, %139 : vector<32x8xf32>
    %141 = arith.addf %123, %124 : vector<32x8xf32>
    %142 = tpu.concatenate %119, %141 in 1 : vector<32x8xf32>, vector<32x8xf32> -> vector<32x16xf32>
    %143 = arith.truncf %142 : vector<32x16xf32> to vector<32x16xbf16>
    %cst_37 = arith.constant dense<0.000000e+00> : vector<64x16xf32>
    %144 = tpu.matmul %0, %143, %cst_37 {dimension_numbers = #tpu.dot_dimension_numbers<[1], [0], [0], [1], [0, 0, 1, 1], [], []>} : vector<64x32xbf16>, vector<32x16xbf16>, vector<64x16xf32> -> vector<64x16xf32>
    %145 = vector.broadcast %5 : vector<64x1xf32> to vector<64x16xf32>
    %146 = arith.addf %144, %145 : vector<64x16xf32>
    %147 = vector.extract_strided_slice %146 {offsets = [0, 0], sizes = [32, 8], strides = [1, 1]} : vector<64x16xf32> to vector<32x8xf32>
    %148 = vector.extract_strided_slice %146 {offsets = [32, 0], sizes = [32, 8], strides = [1, 1]} : vector<64x16xf32> to vector<32x8xf32>
    %149 = arith.truncf %148 : vector<32x8xf32> to vector<32x8xbf16>
    %150 = vector.extract_strided_slice %146 {offsets = [32, 8], sizes = [32, 8], strides = [1, 1]} : vector<64x16xf32> to vector<32x8xf32>
    %151 = vector.broadcast %6 : vector<32x1xf32> to vector<32x8xf32>
    %152 = arith.addf %150, %151 : vector<32x8xf32>
    %153 = arith.truncf %152 : vector<32x8xf32> to vector<32x8xbf16>
    %154 = arith.addf %119, %147 : vector<32x8xf32>
    %155 = tpu.concatenate %154, %140 in 1 : vector<32x8xf32>, vector<32x8xf32> -> vector<32x16xf32>
    %156 = arith.truncf %155 : vector<32x16xf32> to vector<32x16xbf16>
    %cst_38 = arith.constant dense<0.000000e+00> : vector<64x16xf32>
    %157 = tpu.matmul %1, %156, %cst_38 {dimension_numbers = #tpu.dot_dimension_numbers<[1], [0], [0], [1], [0, 0, 1, 1], [], []>} : vector<64x32xbf16>, vector<32x16xbf16>, vector<64x16xf32> -> vector<64x16xf32>
    %158 = vector.broadcast %4 : vector<64x1xf32> to vector<64x16xf32>
    %159 = arith.addf %157, %158 : vector<64x16xf32>
    %160 = vector.extract_strided_slice %159 {offsets = [0, 0], sizes = [32, 8], strides = [1, 1]} : vector<64x16xf32> to vector<32x8xf32>
    %161 = arith.truncf %160 : vector<32x8xf32> to vector<32x8xbf16>
    %162 = vector.extract_strided_slice %159 {offsets = [0, 8], sizes = [32, 8], strides = [1, 1]} : vector<64x16xf32> to vector<32x8xf32>
    %163 = arith.truncf %162 : vector<32x8xf32> to vector<32x8xbf16>
    %164 = vector.extract_strided_slice %159 {offsets = [32, 0], sizes = [32, 8], strides = [1, 1]} : vector<64x16xf32> to vector<32x8xf32>
    %165 = arith.truncf %164 : vector<32x8xf32> to vector<32x8xbf16>
    %166 = vector.extract_strided_slice %159 {offsets = [32, 8], sizes = [32, 8], strides = [1, 1]} : vector<64x16xf32> to vector<32x8xf32>
    %167 = arith.truncf %166 : vector<32x8xf32> to vector<32x8xbf16>
    %cst_39 = arith.constant dense<0.000000e+00> : vector<32x32xf32>
    %168 = tpu.matmul %149, %167, %cst_39 {dimension_numbers = #tpu.dot_dimension_numbers<[1], [1], [0], [0], [0, 0, 1, 0], [], []>} : vector<32x8xbf16>, vector<32x8xbf16>, vector<32x32xf32> -> vector<32x32xf32>
    %cst_40 = arith.constant 0.176776692 : f32
    %169 = vector.broadcast %cst_40 : f32 to vector<32x32xf32>
    %170 = arith.mulf %168, %169 : vector<32x32xf32>
    %cst_41 = arith.constant dense<0xFF800000> : vector<32xf32>
    %171 = vector.multi_reduction <maximumf>, %170, %cst_41 [1] : vector<32x32xf32> to vector<32xf32>
    %172 = vector.shape_cast %171 : vector<32xf32> to vector<32x1xf32>
    %173 = vector.broadcast %172 : vector<32x1xf32> to vector<32x32xf32>
    %174 = arith.subf %170, %173 : vector<32x32xf32>
    %175 = math.exp %174 : vector<32x32xf32>
    %cst_42 = arith.constant dense<0.000000e+00> : vector<32xf32>
    %176 = vector.multi_reduction <add>, %175, %cst_42 [1] : vector<32x32xf32> to vector<32xf32>
    %177 = vector.shape_cast %176 : vector<32xf32> to vector<32x1xf32>
    %178 = tpu.reciprocal %177 {approx = true} : vector<32x1xf32> -> vector<32x1xf32>
    %179 = vector.broadcast %178 : vector<32x1xf32> to vector<32x32xf32>
    %180 = arith.mulf %175, %179 : vector<32x32xf32>
    %cst_43 = arith.constant dense<0.000000e+00> : vector<32x32xf32>
    %181 = tpu.matmul %153, %165, %cst_43 {dimension_numbers = #tpu.dot_dimension_numbers<[1], [1], [0], [0], [0, 0, 1, 0], [], []>} : vector<32x8xbf16>, vector<32x8xbf16>, vector<32x32xf32> -> vector<32x32xf32>
    %cst_44 = arith.constant 0.176776692 : f32
    %182 = vector.broadcast %cst_44 : f32 to vector<32x32xf32>
    %183 = arith.mulf %181, %182 : vector<32x32xf32>
    %cst_45 = arith.constant dense<0xFF800000> : vector<32xf32>
    %184 = vector.multi_reduction <maximumf>, %183, %cst_45 [1] : vector<32x32xf32> to vector<32xf32>
    %185 = vector.shape_cast %184 : vector<32xf32> to vector<32x1xf32>
    %186 = vector.broadcast %185 : vector<32x1xf32> to vector<32x32xf32>
    %187 = arith.subf %183, %186 : vector<32x32xf32>
    %188 = math.exp %187 : vector<32x32xf32>
    %cst_46 = arith.constant dense<0.000000e+00> : vector<32xf32>
    %189 = vector.multi_reduction <add>, %188, %cst_46 [1] : vector<32x32xf32> to vector<32xf32>
    %190 = vector.shape_cast %189 : vector<32xf32> to vector<32x1xf32>
    %191 = tpu.reciprocal %190 {approx = true} : vector<32x1xf32> -> vector<32x1xf32>
    %192 = vector.broadcast %191 : vector<32x1xf32> to vector<32x32xf32>
    %193 = arith.mulf %188, %192 : vector<32x32xf32>
    %194 = arith.truncf %180 : vector<32x32xf32> to vector<32x32xbf16>
    %cst_47 = arith.constant dense<0.000000e+00> : vector<32x8xf32>
    %195 = tpu.matmul %194, %163, %cst_47 {dimension_numbers = #tpu.dot_dimension_numbers<[1], [0], [0], [1], [0, 0, 1, 1], [], []>} : vector<32x32xbf16>, vector<32x8xbf16>, vector<32x8xf32> -> vector<32x8xf32>
    %196 = arith.addf %119, %195 : vector<32x8xf32>
    %197 = arith.truncf %193 : vector<32x32xf32> to vector<32x32xbf16>
    %cst_48 = arith.constant dense<0.000000e+00> : vector<32x8xf32>
    %198 = tpu.matmul %197, %161, %cst_48 {dimension_numbers = #tpu.dot_dimension_numbers<[1], [0], [0], [1], [0, 0, 1, 1], [], []>} : vector<32x32xbf16>, vector<32x8xbf16>, vector<32x8xf32> -> vector<32x8xf32>
    %199 = vector.extract_strided_slice %3 {offsets = [0, 4], sizes = [32, 1], strides = [1, 1]} : vector<64x6xf32> to vector<32x1xf32>
    %200 = vector.extract_strided_slice %3 {offsets = [32, 4], sizes = [32, 1], strides = [1, 1]} : vector<64x6xf32> to vector<32x1xf32>
    %cst_49 = arith.constant dense<0.000000e+00> : vector<8xf32>
    %201 = vector.multi_reduction <add>, %196, %cst_49 [0] : vector<32x8xf32> to vector<8xf32>
    %202 = vector.shape_cast %201 : vector<8xf32> to vector<1x8xf32>
    %cst_50 = arith.constant 3.200000e+01 : f32
    %203 = vector.broadcast %cst_50 : f32 to vector<1x8xf32>
    %204 = arith.divf %202, %203 : vector<1x8xf32>
    %205 = vector.broadcast %204 : vector<1x8xf32> to vector<32x8xf32>
    %206 = arith.subf %196, %205 : vector<32x8xf32>
    %207 = arith.mulf %206, %206 : vector<32x8xf32>
    %cst_51 = arith.constant dense<0.000000e+00> : vector<8xf32>
    %208 = vector.multi_reduction <add>, %207, %cst_51 [0] : vector<32x8xf32> to vector<8xf32>
    %209 = vector.shape_cast %208 : vector<8xf32> to vector<1x8xf32>
    %cst_52 = arith.constant 3.200000e+01 : f32
    %210 = vector.broadcast %cst_52 : f32 to vector<1x8xf32>
    %211 = arith.divf %209, %210 : vector<1x8xf32>
    %212 = vector.broadcast %204 : vector<1x8xf32> to vector<32x8xf32>
    %213 = arith.subf %196, %212 : vector<32x8xf32>
    %cst_53 = arith.constant 9.99999997E-7 : f32
    %214 = vector.broadcast %cst_53 : f32 to vector<1x8xf32>
    %215 = arith.addf %211, %214 : vector<1x8xf32>
    %216 = math.rsqrt %215 : vector<1x8xf32>
    %217 = vector.broadcast %216 : vector<1x8xf32> to vector<32x8xf32>
    %218 = arith.mulf %213, %217 : vector<32x8xf32>
    %219 = vector.broadcast %199 : vector<32x1xf32> to vector<32x8xf32>
    %220 = arith.mulf %218, %219 : vector<32x8xf32>
    %221 = vector.broadcast %200 : vector<32x1xf32> to vector<32x8xf32>
    %222 = arith.addf %220, %221 : vector<32x8xf32>
    %c0_54 = arith.constant 0 : index
    %c0_55 = arith.constant 0 : index
    %c128_56 = arith.constant 128 : index
    %223 = vector.load %arg6[%c0_54, %c0_55, %c128_56] : memref<1x32x384xf32, #tpu.memory_space<vmem>>, vector<1x32x8xf32>
    %224 = vector.shape_cast %223 : vector<1x32x8xf32> to vector<32x8xf32>
    %225 = vector.shape_cast %222 : vector<32x8xf32> to vector<1x32x8xf32>
    tpu.vector_store %arg6[%c0_54, %c0_55, %c128_56], %225 {strides = array<i32>} : memref<1x32x384xf32, #tpu.memory_space<vmem>>, vector<1x32x8xf32>,
    %226 = arith.addf %123, %198 : vector<32x8xf32>
    %227 = arith.addf %124, %198 : vector<32x8xf32>
    %228 = tpu.concatenate %226, %227 in 1 : vector<32x8xf32>, vector<32x8xf32> -> vector<32x16xf32>
    %229 = vector.extract_strided_slice %3 {offsets = [0, 3], sizes = [32, 1], strides = [1, 1]} : vector<64x6xf32> to vector<32x1xf32>
    %230 = vector.extract_strided_slice %3 {offsets = [32, 3], sizes = [32, 1], strides = [1, 1]} : vector<64x6xf32> to vector<32x1xf32>
    %cst_57 = arith.constant dense<0.000000e+00> : vector<16xf32>
    %231 = vector.multi_reduction <add>, %228, %cst_57 [0] : vector<32x16xf32> to vector<16xf32>
    %232 = vector.shape_cast %231 : vector<16xf32> to vector<1x16xf32>
    %cst_58 = arith.constant 3.200000e+01 : f32
    %233 = vector.broadcast %cst_58 : f32 to vector<1x16xf32>
    %234 = arith.divf %232, %233 : vector<1x16xf32>
    %235 = vector.broadcast %234 : vector<1x16xf32> to vector<32x16xf32>
    %236 = arith.subf %228, %235 : vector<32x16xf32>
    %237 = arith.mulf %236, %236 : vector<32x16xf32>
    %cst_59 = arith.constant dense<0.000000e+00> : vector<16xf32>
    %238 = vector.multi_reduction <add>, %237, %cst_59 [0] : vector<32x16xf32> to vector<16xf32>
    %239 = vector.shape_cast %238 : vector<16xf32> to vector<1x16xf32>
    %cst_60 = arith.constant 3.200000e+01 : f32
    %240 = vector.broadcast %cst_60 : f32 to vector<1x16xf32>
    %241 = arith.divf %239, %240 : vector<1x16xf32>
    %242 = vector.broadcast %234 : vector<1x16xf32> to vector<32x16xf32>
    %243 = arith.subf %228, %242 : vector<32x16xf32>
    %cst_61 = arith.constant 9.99999997E-7 : f32
    %244 = vector.broadcast %cst_61 : f32 to vector<1x16xf32>
    %245 = arith.addf %241, %244 : vector<1x16xf32>
    %246 = math.rsqrt %245 : vector<1x16xf32>
    %247 = vector.broadcast %246 : vector<1x16xf32> to vector<32x16xf32>
    %248 = arith.mulf %243, %247 : vector<32x16xf32>
    %249 = vector.broadcast %229 : vector<32x1xf32> to vector<32x16xf32>
    %250 = arith.mulf %248, %249 : vector<32x16xf32>
    %251 = vector.broadcast %230 : vector<32x1xf32> to vector<32x16xf32>
    %252 = arith.addf %250, %251 : vector<32x16xf32>
    %c0_62 = arith.constant 0 : index
    %c0_63 = arith.constant 0 : index
    %c0_64 = arith.constant 0 : index
    %253 = vector.load %arg6[%c0_62, %c0_63, %c0_64] : memref<1x32x384xf32, #tpu.memory_space<vmem>>, vector<1x32x16xf32>
    %254 = vector.shape_cast %253 : vector<1x32x16xf32> to vector<32x16xf32>
    %255 = vector.shape_cast %252 : vector<32x16xf32> to vector<1x32x16xf32>
    tpu.vector_store %arg6[%c0_62, %c0_63, %c0_64], %255 {strides = array<i32>} : memref<1x32x384xf32, #tpu.memory_space<vmem>>, vector<1x32x16xf32>,
    return
  }
  func.func @transform_0(%arg0: i32) -> (i32, i32, i32) {
    %c0_i32 = arith.constant 0 : i32
    %c0_i32_0 = arith.constant 0 : i32
    %c0_i32_1 = arith.constant 0 : i32
    return %arg0, %c0_i32, %c0_i32_0 : i32, i32, i32
  }
  func.func @transform_1(%arg0: i32) -> (i32, i32, i32) {
    %c0_i32 = arith.constant 0 : i32
    %c0_i32_0 = arith.constant 0 : i32
    %c0_i32_1 = arith.constant 0 : i32
    return %arg0, %c0_i32, %c0_i32_0 : i32, i32, i32
  }
  func.func @transform_2(%arg0: i32) -> (i32, i32) {
    %c0_i32 = arith.constant 0 : i32
    %c0_i32_0 = arith.constant 0 : i32
    %c0_i32_1 = arith.constant 0 : i32
    return %c0_i32, %c0_i32_0 : i32, i32
  }
  func.func @transform_3(%arg0: i32) -> (i32, i32) {
    %c0_i32 = arith.constant 0 : i32
    %c0_i32_0 = arith.constant 0 : i32
    %c0_i32_1 = arith.constant 0 : i32
    return %c0_i32, %c0_i32_0 : i32, i32
  }
  func.func @transform_4(%arg0: i32) -> (i32, i32) {
    %c0_i32 = arith.constant 0 : i32
    %c0_i32_0 = arith.constant 0 : i32
    %c0_i32_1 = arith.constant 0 : i32
    return %c0_i32, %c0_i32_0 : i32, i32
  }
  func.func @transform_5(%arg0: i32) -> (i32, i32, i32) {
    %c0_i32 = arith.constant 0 : i32
    %c0_i32_0 = arith.constant 0 : i32
    %c0_i32_1 = arith.constant 0 : i32
    return %arg0, %c0_i32, %c0_i32_0 : i32, i32, i32
  }
}

</mosaic_0001>

<bundles_post_ra>
// kernel: tpu_custom_call.1
= control target key start
LH: loop header
LB: loop body
LE: loop exit
PB: predicated region body
PF: predicated region fallthrough
CT: control target
= control target key end

     0   :  { %10 = vsyncpa [#allocation3], 0  ;;  %s3758_s0 = inlined_call_operand.vmem [shape: f32[2,32,4], index: 0, kind: input, shape index: {}]   ;;  %s3759_s1 = inlined_call_operand.hbm [shape: f32[2,96,256], index: 1, kind: input, shape index: {}]   ;;  %s3760_s2 = inlined_call_operand.vmem [shape: bf16[128,32], index: 2, kind: input, shape index: {}]   ;;  %s3761_s3 = inlined_call_operand.vmem [shape: bf16[32,96], index: 3, kind: input, shape index: {}]   ;;  %s3762_s4 = inlined_call_operand.vmem [shape: f32[64,6], index: 4, kind: input, shape index: {}]   ;;  %s3763_s5 = inlined_call_operand.hbm [shape: f32[2,32,384], index: 5, kind: output, shape index: {}]  }
   0x1   :  { %12 = vsyncpa [#allocation3 + $0x1], 0 }
   0x2   :  { %13 = vsyncpa [#allocation4], 0 }
   0x3   :  { %15 = vsyncpa [#allocation4 + $0x1], 0  ;;  %s2808_s18 = smov 0   ;;  %s2810_s19 = smov 0  }
   0x4   :  { %s2812_s20 = smov 0   ;;  %s2814_s21 = smov 0  }
   0x5 LB: > { %s2829_s22 = sadd.s32 4294967295, %s2760_s21   ;;  %s2180_s23 = sadd.s32 4294967294, %s2760_s21   ;;  %s2760_s21 = sphi %s2814_s21, %s3807_s21   ;;  %s2756_s20 = sphi %s2812_s20, %s3806_s20   ;;  %s2752_s19 = sphi %s2810_s19, %s3805_s19   ;;  %s2748_s18 = sphi %s2808_s18, %s3804_s18  }
   0x6   : > { %s2833_s24 = sadd.s32 1, %s2760_s21   ;;  %s54_s25 = sadd.s32 1, %s2756_s20 }
   0x7   : > { %s51_s26 = ssub.s32 %s2760_s21, %s2833_s24  ;;  %p61_p0 = scmp.ne.s32.totalorder %s2756_s20, %s2752_s19 }
   0x8   : > { %p52_p1 = scmp.eq.s32.totalorder %s51_s26, 0  ;;  %p62_p2 = scmp.eq.s32.totalorder %s2760_s21, 0 }
   0x9   : > { %p67_p3 = scmp.ne.s32.totalorder %s2752_s19, %s2748_s18  ;;  %p68_p4 = scmp.eq.s32.totalorder %s2829_s22, 0 }
   0xa   : > { %s2845_s27 = scalar_select %p52_p1, %s2756_s20, %s54_s25  }
   0xb   : > { %p63_p5 = por %p62_p2, %p61_p0  ;;  %p2847_p6 = por %p68_p4, %p67_p3 }
   0xc   : > { %p154_p7 = scmp.eq.s32.totalorder %s2829_s22, 1  ;;  %p160_p8 = scmp.eq.s32.totalorder %s2180_s23, 1 }
   0xd   : > { %s3776_s28 = scalar_select %p2847_p6, 1, 0 }
   0xe   : > { %p2478_p10 = scmp.lt.s32.totalorder %s2760_s21, 2  ;;  %p2854_p11 = por %p154_p7, %p61_p0 }
   0xf   : > { %p2858_p12 = por %p160_p8, %p67_p3  ;;  %s197_s6 = sand.u32 1, %s2756_s20  }
  0x10   : > { %s3777_s29 = scalar_select %p2854_p11, 1, 0 }
  0x11   : > { %s3778_s30 = scalar_select %p2858_p12, 1, 0 }
  0x12   : > { %s2462_s7 = smul.u32 3072, %s2760_s21  ;;  %p2869_p13 = pnand %p2478_p10, %p63_p5 }
  0x13   : > { %s2461_s8 = smul.u32 192, %s197_s6  ;;  %s2875_s15 = scalar_lea.sflag [#allocation3], %s197_s6 }
  0x14   : > { %s2867_s11 = scalar_lea.hbm %s3759_s1, %s2462_s7  ;;  %p2670_p1 = pneg %p2869_p13 }
  0x15   : > { %s201_s13 = scalar_lea.vmem [#allocation2], %s2461_s8  ;;  %s2668_s16 = scalar_lea.hbm %s2867_s11, 3072 }
  0x16   : > { %s208_s14 = sshll.u32 %s201_s13, 4  ;;  %p2669_p0 = scmp.ne.s32.totalorder %s2867_s11, %s2668_s16  ;;  %s2873_s14 = int_to_ptr.vmem [resolvable:$true] %s208_s14 }
  0x17   : > { %s2673_s25 = scalar_lea.hbm %s3759_s1, 6144  ;;  %p2674_p4 = scmp.lt.s32.totalorder %s2867_s11, %s3759_s1 }
  0x18   : > { %p2671_p2 = pnand %p2670_p1, %p2669_p0  ;;  %p2675_p5 = scmp.lt.s32.totalorder %s2673_s25, %s2668_s16 }
  0x1a   : > { %p2672_p3 = pneg %p2671_p2  ;;  %p2676_p7 = por %p2675_p5, %p2674_p4 }
  0x1c   : > { %p2677_p8 = pnand %p2676_p7, %p2672_p3 }
  0x1e   : > { %2680 = shalt.err (!%p2677_p8)
}
  0x1f   : > { %s2681_s6 = scalar_lea.vmem %s2873_s14, 3072  ;;  %s2762_s8 = smov [#allocation2]  }
  0x20   : > { %p2682_p10 = scmp.ne.s32.totalorder %s2873_s14, %s2681_s6  ;;  %s2686_s9 = sshll.u32 %s2762_s8, 4  ;;  %s2687_s9 = int_to_ptr.vmem [resolvable:$false] %s2686_s9 }
  0x21   : > { %s2688_s10 = scalar_lea.vmem %s2687_s9, 6144  ;;  %p2689_p2 = scmp.lt.s32.totalorder %s2873_s14, %s2687_s9 }
  0x22   : > { %p2684_p9 = pnand %p2682_p10, %p2670_p1  ;;  %p2690_p12 = scmp.lt.s32.totalorder %s2688_s10, %s2681_s6 }
  0x24   : > { %p2685_p0 = pneg %p2684_p9  ;;  %p2691_p11 = por %p2690_p12, %p2689_p2 }
  0x26   : > { %p2692_p6 = pnand %p2691_p11, %p2685_p0 }
  0x28   : > { %2695 = shalt.err (!%p2692_p6)
}
  0x29   : > { %s2763_s13 = smov 256   ;;  %s2764_s16 = smov 16  }
  0x2a   : > { %2473 = dma.hbm_to_vmem [thread:$0]  (!%p2869_p13), %s2867_s11, 3072, %s2873_s14, %s2875_s15, %s2763_s13, %s2763_s13, %s2764_s16  }
  0x2b   : > { %p2184_p9 = scmp.ge.s32.totalorder %s2760_s21, 1  ;;  %p216_p1 = scmp.lt.s32.totalorder %s2760_s21, 3 }
  0x2d   : > { %p217_p3 = pnand %p2184_p9, %p216_p1 }
  0x2f   : > { %220 = sbr.rel (%p217_p3) target bundleno = 2892 (0xb4c), region = 40 }
  0x34   : > { %s2899_s17 = sand.u32 1, %s2752_s19   ;;  %p3780_p6 = scmp.ne.s32.totalorder %s3776_s28, 0 }
  0x35   : > { %s2463_s23 = smul.u32 192, %s2899_s17  ;;  %s223_s25 = scalar_lea.sflag [#allocation3], %s2899_s17 }
  0x37   : > { %s2903_s26 = scalar_lea.vmem [#allocation2], %s2463_s23 }
  0x38   : > { %2739 = dma.done.wait (%p3780_p6), %s223_s25, 3072  }
  0x39   : > { %2741 = vsyncadd (%p3780_p6), %s223_s25, 4294964224  ;;  %v2765_v0 = vmov 2   ;;  %v2910_v1 = vld [vmem:[%s2903_s26 + $0xa0] sm:$0xff]  ;;  %v2913_v2 = vld [vmem:[%s2903_s26 + $0xb0] sm:$0xff]  ;;  %vm359_vm0 = vcmask 785408   ;;  %s2766_s12 = smov 4   ;;  %v308_v59 = vlaneseq }
  0x3a   : > { %2536 = vset.pattern.permute.xlu1 %v2765_v0  ;;  %2537 = vset.pattern.permute.xlu0 %v2765_v0  ;;  %v2916_v3 = vld [vmem:[%s2903_s26 + $0x80] sm:$0xff]  ;;  %v328_v4 = vpack.c.bf16 %v2913_v2, %v2910_v1  ;;  %v2921_v5 = vld [vmem:[%s2903_s26 + $0x90] sm:$0xff]  ;;  %v2964_v20 = vld [vmem:[%s3762_s4 + $0x18] sm:$0xff]  ;;  %vm526_vm1 = vcmask 261120   ;;  %v2767_v36 = vmov 1   ;;  %p258_p11 = scmp.lt.s32.totalorder %s2829_s22, 1 }
  0x3b   : > { %v2924_v6 = vld [vmem:[%s2903_s26 + $0x60] sm:$0xff]  ;;  %v2927_v7 = vld [vmem:[%s2903_s26 + $0x70] sm:$0xff]  ;;  %v327_v8 = vpack.c.bf16 %v2921_v5, %v2916_v3  ;;  %v2992_v27 = vld [vmem:[%s3762_s4 + $0x38] sm:$0xff]  ;;  %vm467_vm2 = vcmask 31744   ;;  %v3086_v61 = vand.u32 127, %v308_v59  ;;  %s2769_s14 = smov 124  }
  0x3c   : > { %v449_v9 = vadd.f32 %v2910_v1, %v2924_v6  ;;  %v450_v10 = vadd.f32 %v2913_v2, %v2927_v7  ;;  %v2936_v11 = vld [vmem:[%s2903_s26 + $0x40] sm:$0xff]  ;;  %v2939_v12 = vld [vmem:[%s2903_s26 + $0x50] sm:$0xff]  ;;  %2309 = vmatprep.subr.bf16.mxu0 %v328_v4  ;;  %v326_v17 = vpack.c.bf16 %v2927_v7, %v2924_v6  ;;  %v3010_v31 = vld [vmem:[%s3762_s4 + $0x8] sm:$0xff]  ;;  %s259_s13 = scalar_select %p258_p11, %s2829_s22, 1  ;;  %vm1349_vm4 = vcmask 64512  }
  0x3d   : > { %v447_v13 = vadd.f32 %v2916_v3, %v2936_v11  ;;  %v448_v14 = vadd.f32 %v2921_v5, %v2939_v12  ;;  %2310 = vmatpush3.bf16.msra.mxu0 %v328_v4  ;;  %v2948_v16 = vld [vmem:[%s3761_s3] sm:$0xff]   ;;  %v2958_v19 = vld [vmem:[%s3762_s4 + $0x10] sm:$0xff]  ;;  %v325_v21 = vpack.c.bf16 %v2939_v12, %v2936_v11  ;;  %v3020_v33 = vld [vmem:[%s3762_s4 + $0x28] sm:$0xff]  ;;  %vm310_vm3 = vcmp.eq.s32.totalorder %v3086_v61, 0  ;;  %s2770_s15 = smov 8   ;;  %s2464_s7 = smul.u32 96, %s2899_s17 }
  0x3e   : > { %v2526_v15 = vpack.i.bf16 %v450_v10, %v449_v9  ;;  %2311 = vmatprep.subr.bf16.mxu0 %v327_v8  ;;  %2321 = vmatprep.mubr.msk.bf16.mxu0 %vm359_vm0, %v2948_v16  ;;  %v2969_v22 = vld [vmem:[%s2903_s26 + $0x20] sm:$0xff]  ;;  %v2972_v23 = vld [vmem:[%s2903_s26 + $0x30] sm:$0xff]  ;;  %v3031_v35 = vld [vmem:[%s3761_s3 + $0x8] sm:$0xff]   ;;  %s2236_s16 = sshll.u32 %s259_s13, 5  ;;  %v313_v4 = vmax.f32 %v2924_v6, %v2910_v1  ;;  %v314_v9 = vmax.f32 %v2927_v7, %v2913_v2  ;;  %vm1994_vm5 = vcmask 130048   ;;  %s2465_s8 = smul.u32 1536, %s2829_s22 }
  0x3f   : > { %v2531_v18 = vpack.i.bf16 %v448_v14, %v447_v13  ;;  %341 = vperm.xlu1 %2536, %v2958_v19   ;;  %v2978_v24 = vld [vmem:[%s3760_s2] sm:$0xff]   ;;  %v2984_v25 = vld [vmem:[%s3762_s4 + $0x30] sm:$0xff]  ;;  %v324_v28 = vpack.c.bf16 %v2972_v23, %v2969_v22  ;;  %s262_s28 = scalar_lea.vmem %s3758_s0, %s2236_s16  ;;  %v3064_v53 = vld [vmem:[%s3760_s2 + $0x8] sm:$0xff]   ;;  %v317_v10 = vsel %vm310_vm3, %v2924_v6, %v2969_v22  ;;  %v318_v13 = vsel %vm310_vm3, %v2927_v7, %v2972_v23  ;;  %s3639_s6 = scalar_lea.vmem [#allocation5], %s2464_s7 }
  0x40   : > { %2527 = vrot.lane.b32.xlu0 %v2526_v15, %s2766_s12  ;;  %v2987_v26 = vld [vmem:[%s2903_s26] sm:$0xff]  ;;  %2329 = vmatprep.mubr.msk.bf16.mxu1 %vm526_vm1, %v2978_v24  ;;  %v2999_v29 = vld [vmem:[%s2903_s26 + $0x10] sm:$0xff]  ;;  %v3047_v39 = vld [vmem:[%s262_s28 + $0x18] sm:$0xff]  ;;  %v311_v15 = vmax.f32 %v2936_v11, %v2916_v3  ;;  %s2095_s9 = sshll.u32 %s3639_s6, 4  ;;  %s3703_s13 = scalar_lea.hbm %s3763_s5, %s2465_s8  ;;  %s3711_s9 = int_to_ptr.vmem [resolvable:$true] %s2095_s9 }
  0x41   : > { %2312 = vmatpush3.bf16.msra.mxu0 %v327_v8  ;;  %v3004_v30 = vld [vmem:[%s3762_s4] sm:$0xff]  ;;  %v323_v32 = vpack.c.bf16 %v2999_v29, %v2987_v26  ;;  %v3045_v38 = vld [vmem:[%s262_s28 + $0x10] sm:$0xff]  ;;  %v3055_v47 = vld [vmem:[%s262_s28 + $0x8] sm:$0xff]  ;;  %v316_v23 = vsel %vm310_vm3, %v2939_v12, %v2999_v29  ;;  %s2082_s16 = scalar_lea.sflag [#allocation4], %s2899_s17  ;;  %s2696_s23 = scalar_lea.vmem %s3711_s9, 1536 }
  0x42   : > { %2313 = vmatprep.subr.bf16.mxu0 %v326_v17  ;;  %v3025_v34 = vld [vmem:[%s3762_s4 + $0x20] sm:$0xff]  ;;  %v3069_v54 = vld [vmem:[%s3760_s2 + $0x10] sm:$0xff]   ;;  %v3078_v55 = vld [vmem:[%s3760_s2 + $0x18] sm:$0xff]   ;;  %p2697_p12 = scmp.ne.s32.totalorder %s3711_s9, %s2696_s23  ;;  %p3801_p13 = scmp.ne.s32.totalorder %s3777_s29, 0 }
  0x43   : > { %346 = vperm.xlu1 %2536, %v2964_v20   ;;  %v3053_v46 = vld [vmem:[%s262_s28] sm:$0xff]  ;;  %s2775_s25 = smov [#allocation5]  }
  0x44   : > { %2532 = vrot.lane.b32.xlu0 %v2531_v18, %s2766_s12  ;;  %v315_v18 = vsel %vm310_vm3, %v2936_v11, %v2987_v26  ;;  %p2698_p4 = pnand %p2697_p12, %p3801_p13  ;;  %s2700_s28 = sshll.u32 %s2775_s25, 4  ;;  %s2701_s28 = int_to_ptr.vmem [resolvable:$false] %s2700_s28 }
  0x45   : > { %2314 = vmatpush3.bf16.msra.mxu0 %v326_v17  ;;  %s2702_s11 = scalar_lea.vmem %s2701_s28, 3072  ;;  %p2703_p7 = scmp.lt.s32.totalorder %s3711_s9, %s2701_s28 }
  0x46   : > { %2315 = vmatprep.subr.bf16.mxu0 %v325_v21  ;;  %p2699_p5 = pneg %p2698_p4  ;;  %p2704_p8 = scmp.lt.s32.totalorder %s2702_s11, %s2696_s23 }
  0x47   : > { %432 = vperm.xlu1 %2536, %v2992_v27  }
  0x48   : > { %427 = vperm.xlu0 %2537, %v2984_v25   ;;  %p2705_p10 = por %p2704_p8, %p2703_p7 }
  0x49   : > { %2316 = vmatpush3.bf16.msra.mxu0 %v325_v21 }
  0x4a   : > { %2317 = vmatprep.subr.bf16.mxu0 %v324_v28  ;;  %p2706_p0 = pnand %p2705_p10, %p2699_p5 }
  0x4b   : > { %331 = vperm.xlu1 %2536, %v3004_v30  }
  0x4c   : > { %336 = vperm.xlu0 %2537, %v3010_v31  }
  0x4d   : > { %2318 = vmatpush3.bf16.msra.mxu0 %v324_v28  ;;  %v312_v28 = vmax.f32 %v2939_v12, %v2921_v5 }
  0x4e   : > { %2319 = vmatprep.subr.bf16.mxu0 %v323_v32 }
  0x4f   : > { %417 = vperm.xlu1 %2536, %v3025_v34  }
  0x50   : > { %422 = vperm.xlu0 %2537, %v3020_v33  }
  0x51   : > { %2320 = vmatpush3.bf16.msra.mxu0 %v323_v32 }
  0x53   : > { %2538 = vset.pattern.permute.xlu1 %v2767_v36 }
  0x54   : > { %2539 = vset.pattern.permute.xlu0 %v2767_v36  ;;  %2322 = vmatmul.mubr.msk.bf16.vlgmr.msra.gmra.mxu0 %vm359_vm0, %v3031_v35  ;;  %v321_v36 = vmax.f32 %v313_v4, %v317_v10  ;;  %v2768_v10 = vmov 0  }
  0x55   : > { %483 = vperm.xlu1 %2538, %v2958_v19   ;;  %487 = vperm.xlu0 %2539, %v2964_v20  }
  0x59   : > { %475 = vperm.xlu1 %2538, %v3004_v30  }
  0x5d   : > { %479 = vperm.xlu1 %2538, %v3010_v31  }
  0xb2   : > { %v2528_v37 = vpop.permute.xlu0 %2527 }
  0xb3   : > { %v2530_v40 = vunpack.i.h.bf16 %v2528_v37  ;;  %v2529_v41 = vunpack.i.l.bf16 %v2528_v37 }
  0xb5   : > { %v470_v42 = vsel %vm467_vm2, %v3045_v38, %v2529_v41  ;;  %v471_v43 = vsel %vm467_vm2, %v3047_v39, %v2530_v40  ;;  %v322_v41 = vmax.f32 %v314_v9, %v318_v13 }
  0xb6   : > { %v2533_v44 = vpop.permute.xlu0 %2532  ;;  %v473_v45 = vpack.c.bf16 %v471_v43, %v470_v42 }
  0xb7   : > { %v2535_v48 = vunpack.i.h.bf16 %v2533_v44  ;;  %v2534_v49 = vunpack.i.l.bf16 %v2533_v44  ;;  %v319_v44 = vmax.f32 %v311_v15, %v315_v18 }
  0xb8   : > { %2325 = vmatprep.subr.bf16.mxu1 %v473_v45 }
  0xb9   : > { %2326 = vmatpush3.bf16.msra.mxu1 %v473_v45  ;;  %v468_v50 = vsel %vm467_vm2, %v3053_v46, %v2534_v49  ;;  %v469_v51 = vsel %vm467_vm2, %v3055_v47, %v2535_v48  ;;  %v320_v49 = vmax.f32 %v312_v28, %v316_v23 }
  0xba   : > { %v472_v52 = vpack.c.bf16 %v469_v51, %v468_v50  ;;  %v3082_v56 = vpop.permute.xlu1 %341 }
  0xbc   : > { %2327 = vmatprep.subr.bf16.mxu1 %v472_v52 }
  0xbd   : > { %2328 = vmatpush3.bf16.msra.mxu1 %v472_v52 }
  0xbe   : > { %v3084_v57 = vpop.permute.xlu1 %346 }
  0xc0   : > { %2330 = vmatmul.mubr.msk.bf16.vlgmr.msra.gmra.mxu1 %vm526_vm1, %v3064_v53 }
  0xc1   : > { %2333 = vmatprep.mubr.msk.bf16.mxu1 %vm526_vm1, %v3069_v54 }
  0xc2   : > { %v433_v58 = vpop.permute.xlu1 %432 }
  0xc3   : > { %v428_v60 = vpop.permute.xlu0 %427  ;;  %v3127_v26 = vsel %vm310_vm3, 0.0, %v433_v58 }
  0xc4   : > { %v3108_v14 = vsel %vm310_vm3, 0.0, %v428_v60  ;;  %v3144_v60 = vld [vmem:[%s3760_s2 + $0x20] sm:$0xff]  }
  0xc6   : > { %v3088_v62 = vpop.permute.xlu1 %331 }
  0xc7   : > { %v3090_v63 = vpop.permute.xlu0 %336 }
  0xc8   : > { %2334 = vmatmul.mubr.msk.bf16.gmra.mxu1 %vm526_vm1, %v3078_v55 }
  0xc9   : > { %2341 = vmatprep.mubr.msk.bf16.mxu1 %vm526_vm1, %v3144_v60 }
  0xca   : > { %v418_v21 = vpop.permute.xlu1 %417 }
  0xcb   : > { %v423_v40 = vpop.permute.xlu0 %422  ;;  %v3131_v43 = vsel %vm310_vm3, 0.0, %v418_v21 }
  0xcc   : > { %v3138_v51 = vsel %vm310_vm3, 0.0, %v423_v40 }
  0xd0   : > { %v3158_v13 = vpop.permute.xlu1 %483 }
  0xd4   : > { %v3160_v18 = vpop.permute.xlu1 %475 }
  0xd8   : > { %v3164_v28 = vpop.permute.xlu1 %479 }
 0x114   : > { %v2323_v0 = vpop.f32.mrf.mxu0 }
 0x115   : > { %v409_v8 = vadd.f32 %v2323_v0, %v3082_v56 }
 0x116   : > { %v400_v17 = vpop.f32.mrf.mxu0 }
 0x117   : > { %v401_v22 = vadd.f32 %v400_v17, %v3088_v62  ;;  %v441_v37 = vadd.f32 %v3108_v14, %v409_v8 }
 0x118   : > { %v2324_v32 = vpop.f32.mrf.mxu0 }
 0x119   : > { %v412_v42 = vadd.f32 %v2324_v32, %v3084_v57  ;;  %v439_v29 = vadd.f32 %v3131_v43, %v401_v22  ;;  %v445_v52 = vadd.f32 %v441_v37, %v321_v36  ;;  %v3162_v22 = vpop.permute.xlu0 %487 }
 0x11a   : > { %v403_v45 = vpop.f32.mrf.mxu0 }
 0x11b   : > { %v442_v48 = vadd.f32 %v3127_v26, %v412_v42  ;;  %v404_v50 = vadd.f32 %v403_v45, %v3090_v63  ;;  %v443_v0 = vadd.f32 %v439_v29, %v319_v44 }
 0x11d   : > { %v446_v58 = vadd.f32 %v442_v48, %v322_v41  ;;  %v440_v59 = vadd.f32 %v3138_v51, %v404_v50 }
 0x11f   : > { %v444_v4 = vadd.f32 %v440_v59, %v320_v49  ;;  %v2540_v8 = vpack.i.bf16 %v446_v58, %v445_v52 }
 0x121   : > { %2541 = vrot.lane.b32.xlu0 %v2540_v8, %s2766_s12  ;;  %v2545_v9 = vpack.i.bf16 %v444_v4, %v443_v0 }
 0x123   : > { %2546 = vrot.lane.b32.xlu1 %v2545_v9, %s2766_s12 }
 0x125   : > { %491 = vperm.xlu0 %2539, %v3025_v34  }
 0x127   : > { %495 = vperm.xlu1 %2538, %v3020_v33  }
 0x129   : > { %499 = vperm.xlu0 %2539, %v2984_v25  }
 0x12b   : > { %503 = vperm.xlu1 %2538, %v2992_v27  }
 0x12d   : > { %2550 = vset.pattern.permute.xlu0 %v2768_v10 }
 0x12e   : > { %663 = vperm.xlu0 %2550, %v2984_v25  }
 0x12f   : > { %2551 = vset.pattern.permute.xlu1 %v2768_v10  ;;  %v3181_v10 = vld [vmem:[%s3760_s2 + $0x28] sm:$0xff]  }
 0x130   : > { %667 = vperm.xlu1 %2551, %v2992_v27  }
 0x132   : > { %659 = vperm.xlu0 %2550, %v3020_v33  }
 0x134   : > { %655 = vperm.xlu1 %2551, %v3025_v34  }
 0x180   : > { %v2331_v15 = vpop.f32.mrf.mxu1 }
 0x181   : > { %v582_v25 = vadd.f32 %v2331_v15, %v3158_v13  ;;  %v3186_v15 = vld [vmem:[%s3760_s2 + $0x30] sm:$0xff]  }
 0x182   : > { %v573_v17 = vpop.f32.mrf.mxu1  ;;  %3781 = vst [vmem:[#allocation8_spill] sm:$0xff] %v3186_v15 }
 0x183   : > { %v574_v33 = vadd.f32 %v573_v17, %v3160_v18  ;;  %v614_v36 = vadd.f32 %v582_v25, %v3045_v38 }
 0x184   : > { %v2332_v21 = vpop.f32.mrf.mxu1 }
 0x185   : > { %v585_v27 = vadd.f32 %v2332_v21, %v3162_v22  ;;  %v612_v44 = vadd.f32 %v574_v33, %v3053_v46 }
 0x186   : > { %v576_v23 = vpop.f32.mrf.mxu1 }
 0x187   : > { %v577_v34 = vadd.f32 %v576_v23, %v3164_v28  ;;  %v615_v37 = vadd.f32 %v585_v27, %v3047_v39 }
 0x188   : > { %v2335_v42 = vpop.f32.mrf.mxu1 }
 0x189   : > { %v613_v45 = vadd.f32 %v577_v34, %v3055_v47 }
 0x18a   : > { %v589_v4 = vpop.f32.mrf.mxu1 }
 0x18c   : > { %v2336_v9 = vpop.f32.mrf.mxu1 }
 0x18e   : > { %v592_v21 = vpop.f32.mrf.mxu1 }
 0x193   : > { %v2542_v32 = vpop.permute.xlu0 %2541 }
 0x194   : > { %v2544_v40 = vunpack.i.h.bf16 %v2542_v32  ;;  %v2543_v41 = vunpack.i.l.bf16 %v2542_v32 }
 0x195   : > { %v2547_v29 = vpop.permute.xlu1 %2546 }
 0x196   : > { %v2549_v48 = vunpack.i.h.bf16 %v2547_v29  ;;  %v2548_v49 = vunpack.i.l.bf16 %v2547_v29  ;;  %v634_v50 = vsel %vm467_vm2, %v614_v36, %v2543_v41  ;;  %v635_v52 = vsel %vm467_vm2, %v615_v37, %v2544_v40  ;;  %v3206_v40 = vld [vmem:[%s3760_s2 + $0x38] sm:$0xff]  }
 0x197   : > { %v637_v58 = vpack.c.bf16 %v635_v52, %v634_v50  ;;  %3782 = vst [vmem:[#allocation9_spill] sm:$0xff] %v3206_v40 }
 0x198   : > { %v632_v59 = vsel %vm467_vm2, %v612_v44, %v2548_v49  ;;  %v633_v0 = vsel %vm467_vm2, %v613_v45, %v2549_v48 }
 0x199   : > { %2337 = vmatprep.subr.bf16.mxu1 %v637_v58  ;;  %v636_v8 = vpack.c.bf16 %v633_v0, %v632_v59 }
 0x19a   : > { %2338 = vmatpush3.bf16.msra.mxu1 %v637_v58 }
 0x19b   : > { %2339 = vmatprep.subr.bf16.mxu1 %v636_v8 }
 0x19e   : > { %2340 = vmatpush3.bf16.msra.mxu1 %v636_v8 }
 0x1a0   : > { %v3188_v17 = vpop.permute.xlu0 %491 }
 0x1a1   : > { %2342 = vmatmul.mubr.msk.bf16.vlgmr.msra.gmra.mxu1 %vm526_vm1, %v3181_v10  ;;  %v590_v23 = vadd.f32 %v589_v4, %v3188_v17 }
 0x1a2   : > { %v3193_v25 = vpop.permute.xlu1 %495  ;;  %2345 = vmatprep.mubr.msk.bf16.mxu1 %vm526_vm1, %v3186_v15 }
 0x1a3   : > { %v593_v27 = vadd.f32 %v592_v21, %v3193_v25  ;;  %v606_v37 = vadd.f32 %v590_v23, %v3188_v17 }
 0x1a4   : > { %v3198_v33 = vpop.permute.xlu0 %499 }
 0x1a5   : > { %v604_v34 = vpack.c.bf16 %v593_v27, %v590_v23  ;;  %v607_v32 = vadd.f32 %v593_v27, %v3193_v25  ;;  %v598_v36 = vadd.f32 %v2335_v42, %v3198_v33 }
 0x1a6   : > { %v3208_v41 = vpop.permute.xlu1 %503 }
 0x1a7   : > { %v601_v44 = vadd.f32 %v2336_v9, %v3208_v41  ;;  %2353 = vmatprep.mubr.msk.bf16.mxu0 %vm467_vm2, %v604_v34  ;;  %v610_v45 = vpack.c.bf16 %v607_v32, %v606_v37  ;;  %v608_v29 = vadd.f32 %v598_v36, %v3198_v33 }
 0x1a9   : > { %v605_v48 = vpack.c.bf16 %v601_v44, %v598_v36  ;;  %v609_v49 = vadd.f32 %v601_v44, %v3208_v41  ;;  %888 = vrot.lane.b32.xlu1 %v610_v45, %s2769_s14  ;;  %2346 = vmatmul.mubr.msk.bf16.gmra.mxu1 %vm526_vm1, %v3206_v40  ;;  %v3231_v9 = vpop.permute.xlu0 %663 }
 0x1aa   : > { %3785 = vst [vmem:[#allocation12_spill] sm:$0xff] %v3231_v9 }
 0x1ab   : > { %v611_v42 = vpack.c.bf16 %v609_v49, %v608_v29  ;;  %v3218_v50 = vpop.permute.xlu1 %667 }
 0x1ac   : > { %3783 = vst [vmem:[#allocation10_spill] sm:$0xff] %v3218_v50 }
 0x1ad   : > { %890 = vrot.lane.b32.xlu0 %v611_v42, %s2769_s14  ;;  %v3235_v36 = vpop.permute.xlu0 %659 }
 0x1ae   : > { %3786 = vst [vmem:[#allocation13_spill] sm:$0xff] %v3235_v36 }
 0x1af   : > { %v3220_v52 = vpop.permute.xlu1 %655 }
 0x1b0   : > { %3784 = vst [vmem:[#allocation11_spill] sm:$0xff] %v3220_v52 }
 0x21b   : > { %v889_v58 = vpop.permute.xlu1 %888 }
 0x21c   : > { %2361 = vmatprep.mubr.msk.bf16.mxu1 %vm467_vm2, %v889_v58 }
 0x261   : > { %v3223_v59 = vpop.f32.mrf.mxu1 }
 0x263   : > { %v3225_v0 = vpop.f32.mrf.mxu1 }
 0x265   : > { %v3227_v4 = vpop.f32.mrf.mxu1 }
 0x267   : > { %v3229_v8 = vpop.f32.mrf.mxu1 }
 0x269   : > { %v2347_v21 = vpop.f32.mrf.mxu1 }
 0x26a   : > { %v761_v34 = vadd.f32 %v2347_v21, %v3231_v9  ;;  %v891_v21 = vpop.permute.xlu0 %890 }
 0x26b   : > { %v752_v23 = vpop.f32.mrf.mxu1 }
 0x26c   : > { %v753_v44 = vadd.f32 %v752_v23, %v3220_v52 }
 0x26d   : > { %v2348_v27 = vpop.f32.mrf.mxu1 }
 0x26e   : > { %v764_v32 = vadd.f32 %v2348_v27, %v3218_v50 }
 0x26f   : > { %v755_v37 = vpop.f32.mrf.mxu1 }
 0x270   : > { %v770_v45 = vpack.c.bf16 %v764_v32, %v761_v34  ;;  %v756_v29 = vadd.f32 %v755_v37, %v3235_v36 }
 0x272   : > { %v769_v49 = vpack.c.bf16 %v756_v29, %v753_v44  ;;  %775 = vrot.lane.b32.xlu1 %v770_v45, %s2769_s14  ;;  %2455 = vmatprep.subr.msk.bf16.mxu1 %vm467_vm2, %v770_v45  ;;  %v902_v42 = vsel %vm467_vm2, %v770_v45, 0 }
 0x273   : > { %2358 = vmatpush3.bf16.xpose.msra.mxu1 %v902_v42 }
 0x274   : > { %773 = vrot.lane.b32.xlu0 %v769_v49, %s2769_s14  ;;  %2456 = vmatprep.subr.msk.bf16.mxu1 %vm467_vm2, %v769_v49  ;;  %v899_v58 = vsel %vm467_vm2, %v769_v49, 0 }
 0x27b   : > { %2360 = vmatpush3.bf16.xpose.msra.mxu1 %v899_v58 }
 0x282   : > { %2362 = vmatmul.mubr.msk.bf16.vlgmr.msra.gmra.mxu1 %vm467_vm2, %v891_v21 }
 0x2e4   : > { %v776_v23 = vpop.permute.xlu1 %775 }
 0x2e5   : > { %v787_v27 = vsel %vm467_vm2, %v776_v23, 0  ;;  %2453 = vmatprep.subr.msk.bf16.mxu0 %vm467_vm2, %v776_v23 }
 0x2e6   : > { %2350 = vmatpush3.bf16.xpose.msra.mxu0 %v787_v27  ;;  %v774_v34 = vpop.permute.xlu0 %773 }
 0x2e7   : > { %2454 = vmatprep.subr.msk.bf16.mxu0 %vm467_vm2, %v774_v34  ;;  %v784_v32 = vsel %vm467_vm2, %v774_v34, 0 }
 0x2ee   : > { %2352 = vmatpush3.bf16.xpose.msra.mxu0 %v784_v32 }
 0x2f5   : > { %2354 = vmatmul.mubr.msk.bf16.vlgmr.msra.gmra.mxu0 %vm467_vm2, %v605_v48 }
 0x342   : > { %v2363_v37 = vpop.f32.mrf.mxu1 }
 0x343   : > { %v955_v23 = vmul.f32 0.17677669, %v2363_v37 }
 0x344   : > { %v938_v44 = vpop.f32.mrf.mxu1 }
 0x345   : > { %v953_v45 = vmul.f32 0.17677669, %v938_v44  ;;  %v963_v34 = vsel %vm526_vm1, %v955_v23, -inf }
 0x346   : > { %v2364_v29 = vpop.f32.mrf.mxu1 }
 0x347   : > { %v956_v49 = vmul.f32 0.17677669, %v2364_v29  ;;  %v957_v42 = vsel %vm526_vm1, %v953_v45, -inf }
 0x348   : > { %958 = vmax.xlane.f32.xlu1 %v957_v42  ;;  %v941_v58 = vpop.f32.mrf.mxu1 }
 0x349   : > { %v954_v21 = vmul.f32 0.17677669, %v941_v58  ;;  %v966_v27 = vsel %vm526_vm1, %v956_v49, -inf }
 0x34b   : > { %v960_v36 = vsel %vm526_vm1, %v954_v21, -inf }
 0x34c   : > { %967 = vmax.xlane.f32.xlu1 %v966_v27  ;;  %961 = vmax.xlane.f32.xlu0 %v960_v36 }
 0x350   : > { %964 = vmax.xlane.f32.xlu0 %v963_v34 }
 0x35d   : > { %651 = vperm.xlu1 %2551, %v2964_v20  }
 0x366   : > { %647 = vperm.xlu0 %2550, %v2958_v19  }
 0x3d1   : > { %v959_v48 = vpop.xlane.xlu1 %958 }
 0x3d2   : > { %v969_v58 = vsub.f32 %v953_v45, %v959_v48 }
 0x3d4   : > { %v973_v27 = vmul.f32 1.442695, %v969_v58 }
 0x3d5   : > { %v968_v32 = vpop.xlane.xlu1 %967  ;;  %v962_v44 = vpop.xlane.xlu0 %961 }
 0x3d6   : > { %v972_v29 = vsub.f32 %v956_v49, %v968_v32  ;;  %v970_v42 = vsub.f32 %v954_v21, %v962_v44  ;;  %v2355_v32 = vpop.f32.mrf.mxu0 }
 0x3d8   : > { %v979_v37 = vmul.f32 1.442695, %v972_v29  ;;  %v975_v52 = vmul.f32 1.442695, %v970_v42  ;;  %v823_v44 = vpop.f32.mrf.mxu0 }
 0x3d9   : > { %v965_v50 = vpop.xlane.xlu0 %964  ;;  %v3257_v34 = vpop.permute.xlu1 %651  ;;  %v838_v42 = vmul.f32 0.17677669, %v823_v44 }
 0x3da   : > { %2590 = vpow2.f32 %v979_v37  ;;  %v971_v9 = vsub.f32 %v955_v23, %v965_v50  ;;  %3787 = vst [vmem:[#allocation14_spill] sm:$0xff] %v3257_v34  ;;  %v748_v19 = vadd.f32 %v3227_v4, %v3257_v34  ;;  %v2356_v29 = vpop.f32.mrf.mxu0 }
 0x3db   : > { %2592 = vpow2.f32 %v975_v52  ;;  %v841_v37 = vmul.f32 0.17677669, %v2356_v29 }
 0x3dc   : > { %v977_v36 = vmul.f32 1.442695, %v971_v9  ;;  %v826_v58 = vpop.f32.mrf.mxu0 }
 0x3de   : > { %2594 = vpow2.f32 %v977_v36  ;;  %v842_v36 = vsel %vm526_vm1, %v838_v42, -inf }
 0x3df   : > { %2596 = vpow2.f32 %v973_v27  ;;  %v839_v27 = vmul.f32 0.17677669, %v826_v58 }
 0x3e1   : > { %v3259_v20 = vpop.permute.xlu0 %647 }
 0x3e2   : > { %3788 = vst [vmem:[#allocation15_spill] sm:$0xff] %v3259_v20  ;;  %v745_v45 = vadd.f32 %v3223_v59, %v3259_v20 }
 0x3e4   : > { %v3265_v49 = vpack.c.bf16 %v748_v19, %v745_v45  ;;  %v840_v19 = vmul.f32 0.17677669, %v2355_v32  ;;  %v851_v45 = vsel %vm526_vm1, %v841_v37, -inf }
 0x3e6   : > { %2373 = vmatprep.subr.bf16.mxu1 %v3265_v49 }
 0x3e7   : > { %v2591_v50 = vpop.eup %2590  ;;  %2374 = vmatpush3.bf16.msra.mxu1 %v3265_v49 }
 0x3e8   : > { %v990_v52 = vsel %vm526_vm1, %v2591_v50, 0.0  ;;  %v2593_v9 = vpop.eup %2592 }
 0x3e9   : > { %991 = vadd.xlane.f32.xlu1 %v990_v52  ;;  %v984_v23 = vsel %vm526_vm1, %v2593_v9, 0.0  ;;  %v845_v52 = vsel %vm526_vm1, %v839_v27, -inf }
 0x3eb   : > { %v2595_v21 = vpop.eup %2594 }
 0x3ec   : > { %v987_v48 = vsel %vm526_vm1, %v2595_v21, 0.0  ;;  %v2597_v4 = vpop.eup %2596 }
 0x3ed   : > { %985 = vadd.xlane.f32.xlu1 %v984_v23  ;;  %988 = vadd.xlane.f32.xlu0 %v987_v48  ;;  %v981_v59 = vsel %vm526_vm1, %v2597_v4, 0.0 }
 0x3f1   : > { %982 = vadd.xlane.f32.xlu0 %v981_v59 }
 0x3fe   : > { %639 = vperm.xlu1 %2551, %v3004_v30   ;;  %v848_v30 = vsel %vm526_vm1, %v840_v19, -inf }
 0x407   : > { %643 = vperm.xlu0 %2550, %v3010_v31  }
 0x422   : > { %843 = vmax.xlane.f32.xlu1 %v842_v36 }
 0x426   : > { %852 = vmax.xlane.f32.xlu1 %v851_v45  ;;  %846 = vmax.xlane.f32.xlu0 %v845_v52 }
 0x42a   : > { %849 = vmax.xlane.f32.xlu0 %v848_v30 }
 0x472   : > { %v992_v31 = vpop.xlane.xlu1 %991 }
 0x476   : > { %v986_v23 = vpop.xlane.xlu1 %985  ;;  %v989_v48 = vpop.xlane.xlu0 %988 }
 0x477   : > { %2598 = vrcp.f32 %v989_v48 }
 0x478   : > { %2600 = vrcp.f32 %v986_v23 }
 0x479   : > { %2602 = vrcp.f32 %v992_v31 }
 0x47a   : > { %v983_v59 = vpop.xlane.xlu0 %982  ;;  %v3279_v44 = vpop.permute.xlu1 %639 }
 0x47b   : > { %2604 = vrcp.f32 %v983_v59  ;;  %3789 = vst [vmem:[#allocation16_spill] sm:$0xff] %v3279_v44  ;;  %v737_v29 = vadd.f32 %v3225_v0, %v3279_v44 }
 0x482   : > { %v3281_v32 = vpop.permute.xlu0 %643 }
 0x483   : > { %3790 = vst [vmem:[#allocation17_spill] sm:$0xff] %v3281_v32  ;;  %v740_v58 = vadd.f32 %v3229_v8, %v3281_v32 }
 0x484   : > { %v2599_v36 = vpop.eup %2598 }
 0x485   : > { %v767_v45 = vpack.c.bf16 %v740_v58, %v737_v29  ;;  %v2601_v52 = vpop.eup %2600  ;;  %v999_v31 = vmul.f32 %v2599_v36, %v2595_v21  ;;  %v3308_v36 = vld [vmem:[%s2903_s26 + $0xa8] sm:$0xff] }
 0x486   : > { %v2603_v30 = vpop.eup %2602  ;;  %v998_v59 = vmul.f32 %v2601_v52, %v2593_v9  ;;  %v3311_v52 = vld [vmem:[%s2903_s26 + $0xb8] sm:$0xff] }
 0x487   : > { %2375 = vmatprep.subr.bf16.mxu1 %v767_v45  ;;  %v1000_v20 = vmul.f32 %v2603_v30, %v2591_v50 }
 0x488   : > { %v2605_v48 = vpop.eup %2604  ;;  %2376 = vmatpush3.bf16.msra.mxu1 %v767_v45 }
 0x489   : > { %v997_v23 = vmul.f32 %v2605_v48, %v2597_v4  ;;  %v1071_v40 = vpack.c.bf16 %v1000_v20, %v999_v31 }
 0x48b   : > { %v1070_v34 = vpack.c.bf16 %v998_v59, %v997_v23 }
 0x48d   : > { %2377 = vmatprep.mubr.msk.bf16.mxu1 %vm526_vm1, %v1070_v34 }
 0x48e   : > { %2378 = vmatmul.mubr.msk.bf16.vlgmr.msra.gmra.mxu1 %vm526_vm1, %v1071_v40 }
 0x48f   : > { %2401 = vmatprep.mubr.msk.bf16.mxu1 %vm526_vm1, %v2978_v24 }
 0x4ab   : > { %v844_v0 = vpop.xlane.xlu1 %843 }
 0x4ac   : > { %v854_v32 = vsub.f32 %v838_v42, %v844_v0 }
 0x4ae   : > { %v858_v9 = vmul.f32 1.442695, %v854_v32  ;;  %v3305_v32 = vld [vmem:[%s2903_s26 + $0x78] sm:$0xff] }
 0x4af   : > { %v853_v8 = vpop.xlane.xlu1 %852  ;;  %v847_v29 = vpop.xlane.xlu0 %846  ;;  %v1332_v48 = vadd.f32 %v3311_v52, %v3305_v32 }
 0x4b0   : > { %v857_v58 = vsub.f32 %v841_v37, %v853_v8  ;;  %v855_v44 = vsub.f32 %v839_v27, %v847_v29 }
 0x4b2   : > { %v864_v15 = vmul.f32 1.442695, %v857_v58  ;;  %v860_v21 = vmul.f32 1.442695, %v855_v44  ;;  %v3302_v44 = vld [vmem:[%s2903_s26 + $0x68] sm:$0xff] }
 0x4b3   : > { %v850_v4 = vpop.xlane.xlu0 %849  ;;  %v1331_v30 = vadd.f32 %v3308_v36, %v3302_v44 }
 0x4b4   : > { %2606 = vpow2.f32 %v864_v15  ;;  %v856_v50 = vsub.f32 %v840_v19, %v850_v4  ;;  %v3334_v4 = vld [vmem:[%s2903_s26 + $0x58] sm:$0xff] }
 0x4b5   : > { %2608 = vpow2.f32 %v860_v21  ;;  %v2552_v31 = vpack.i.bf16 %v1332_v48, %v1331_v30  ;;  %v1271_v48 = vpack.c.bf16 %v3311_v52, %v3308_v36 }
 0x4b6   : > { %v862_v34 = vmul.f32 1.442695, %v856_v50  ;;  %v3337_v50 = vld [vmem:[%s2903_s26 + $0x88] sm:$0xff] }
 0x4b8   : > { %2610 = vpow2.f32 %v862_v34 }
 0x4b9   : > { %2612 = vpow2.f32 %v858_v9 }
 0x4c1   : > { %v3291_v24 = vpop.eup %2606 }
 0x4c2   : > { %v875_v40 = vsel %vm526_vm1, %v3291_v24, 0.0  ;;  %v3295_v20 = vpop.eup %2608 }
 0x4c3   : > { %876 = vadd.xlane.f32.xlu1 %v875_v40  ;;  %v869_v15 = vsel %vm526_vm1, %v3295_v20, 0.0 }
 0x4c5   : > { %v2611_v42 = vpop.eup %2610 }
 0x4c6   : > { %v872_v37 = vsel %vm526_vm1, %v2611_v42, 0.0  ;;  %v2613_v27 = vpop.eup %2612 }
 0x4c7   : > { %870 = vadd.xlane.f32.xlu1 %v869_v15  ;;  %873 = vadd.xlane.f32.xlu0 %v872_v37  ;;  %v866_v19 = vsel %vm526_vm1, %v2613_v27, 0.0 }
 0x4cb   : > { %867 = vadd.xlane.f32.xlu0 %v866_v19 }
 0x4d8   : > { %1005 = vrot.lane.b32.xlu1 %v767_v45, %s2769_s14  ;;  %v3329_v45 = vld [vmem:[%s2903_s26 + $0x48] sm:$0xff] }
 0x4d9   : > { %v1329_v15 = vadd.f32 %v3337_v50, %v3329_v45 }
 0x4dc   : > { %2553 = vrot.lane.b32.xlu1 %v2552_v31, %s2770_s15 }
 0x4e1   : > { %1007 = vrot.lane.b32.xlu0 %v3265_v49, %s2769_s14  ;;  %v3340_v49 = vld [vmem:[%s2903_s26 + $0x98] sm:$0xff] }
 0x4e2   : > { %v1330_v37 = vadd.f32 %v3340_v49, %v3334_v4 }
 0x4e4   : > { %v2557_v30 = vpack.i.bf16 %v1330_v37, %v1329_v15  ;;  %v1270_v37 = vpack.c.bf16 %v3340_v49, %v3337_v50 }
 0x54c   : > { %v877_v23 = vpop.xlane.xlu1 %876 }
 0x54e   : > { %v3321_v59 = vpop.f32.mrf.mxu1 }
 0x54f   : > { %v1220_v0 = vadd.f32 %v3321_v59, %v2910_v1 }
 0x550   : > { %v3325_v8 = vpop.f32.mrf.mxu1  ;;  %v871_v29 = vpop.xlane.xlu1 %870 }
 0x551   : > { %v874_v58 = vpop.xlane.xlu0 %873  ;;  %1230 = vrot.lane.b32.xlu1 %v1220_v0, %s2766_s12 }
 0x552   : > { %v3331_v21 = vpop.f32.mrf.mxu1  ;;  %2614 = vrcp.f32 %v874_v58 }
 0x553   : > { %v1221_v1 = vadd.f32 %v3331_v21, %v2913_v2  ;;  %2616 = vrcp.f32 %v871_v29  ;;  %v1218_v2 = vadd.f32 %v3325_v8, %v2916_v3 }
 0x554   : > { %v3344_v9 = vpop.f32.mrf.mxu1  ;;  %2618 = vrcp.f32 %v877_v23 }
 0x555   : > { %v1219_v34 = vadd.f32 %v3344_v9, %v2921_v5  ;;  %v868_v40 = vpop.xlane.xlu0 %867  ;;  %1232 = vrot.lane.b32.xlu0 %v1221_v1, %s2766_s12  ;;  %v1006_v5 = vpop.permute.xlu1 %1005 }
 0x556   : > { %2620 = vrcp.f32 %v868_v40 }
 0x557   : > { %1228 = vrot.lane.b32.xlu1 %v1219_v34, %s2766_s12 }
 0x559   : > { %v1008_v19 = vpop.permute.xlu0 %1007  ;;  %1226 = vrot.lane.b32.xlu0 %v1218_v2, %s2766_s12 }
 0x55a   : > { %2365 = vmatprep.subr.bf16.mxu0 %v1008_v19 }
 0x55b   : > { %2366 = vmatpush3.bf16.msra.mxu0 %v1008_v19  ;;  %v3381_v19 = vld [vmem:[%s2903_s26 + $0x8] sm:$0xff] }
 0x55c   : > { %2367 = vmatprep.subr.bf16.mxu0 %v1006_v5 }
 0x55d   : > { %2558 = vrot.lane.b32.xlu0 %v2557_v30, %s2770_s15 }
 0x55f   : > { %2368 = vmatpush3.bf16.msra.mxu0 %v1006_v5  ;;  %v2615_v31 = vpop.eup %2614  ;;  %v2554_v5 = vpop.permute.xlu1 %2553 }
 0x560   : > { %2381 = vmatprep.subr.bf16.mxu0 %v1271_v48  ;;  %v2617_v23 = vpop.eup %2616  ;;  %v884_v29 = vmul.f32 %v2615_v31, %v2611_v42  ;;  %v3373_v42 = vld [vmem:[%s2903_s26 + $0x28] sm:$0xff]  ;;  %v1216_v31 = vadd.f32 %v3321_v59, %v2924_v6 }
 0x561   : > { %v2619_v3 = vpop.eup %2618  ;;  %v883_v1 = vmul.f32 %v2617_v23, %v3295_v20  ;;  %v1269_v20 = vpack.c.bf16 %v3305_v32, %v3302_v44  ;;  %v2556_v23 = vunpack.i.h.bf16 %v2554_v5 }
 0x562   : > { %v885_v34 = vmul.f32 %v2619_v3, %v3291_v24  ;;  %v1268_v24 = vpack.c.bf16 %v3334_v4, %v3329_v45  ;;  %v2555_v3 = vunpack.i.l.bf16 %v2554_v5 }
 0x563   : > { %v2621_v0 = vpop.eup %2620 }
 0x564   : > { %v882_v58 = vmul.f32 %v2621_v0, %v2613_v27  ;;  %v1002_v15 = vpack.c.bf16 %v885_v34, %v884_v29  ;;  %v3376_v27 = vld [vmem:[%s2903_s26 + $0x38] sm:$0xff]  ;;  %v1217_v0 = vadd.f32 %v3331_v21, %v2927_v7  ;;  %v1214_v7 = vadd.f32 %v3325_v8, %v2936_v11 }
 0x565   : > { %v1267_v2 = vpack.c.bf16 %v3376_v27, %v3373_v42  ;;  %v1215_v21 = vadd.f32 %v3344_v9, %v2939_v12 }
 0x566   : > { %v1001_v40 = vpack.c.bf16 %v883_v1, %v882_v58 }
 0x568   : > { %2369 = vmatprep.mubr.msk.bf16.mxu0 %vm526_vm1, %v1001_v40 }
 0x569   : > { %2370 = vmatmul.mubr.msk.bf16.vlgmr.msra.gmra.mxu0 %vm526_vm1, %v1002_v15 }
 0x56a   : > { %2382 = vmatpush3.bf16.msra.mxu0 %v1271_v48  ;;  %2393 = vmatprep.mubr.msk.bf16.mxu0 %vm359_vm0, %v2948_v16  ;;  %v3384_v16 = vld [vmem:[%s2903_s26 + $0x18] sm:$0xff]  ;;  %s2771_s26 = smov 120  }
 0x56b   : > { %2383 = vmatprep.subr.bf16.mxu0 %v1270_v37  ;;  %v1266_v30 = vpack.c.bf16 %v3384_v16, %v3381_v19 }
 0x56e   : > { %2384 = vmatpush3.bf16.msra.mxu0 %v1270_v37 }
 0x56f   : > { %2385 = vmatprep.subr.bf16.mxu0 %v1269_v20 }
 0x572   : > { %2386 = vmatpush3.bf16.msra.mxu0 %v1269_v20 }
 0x573   : > { %2387 = vmatprep.subr.bf16.mxu0 %v1268_v24 }
 0x576   : > { %2388 = vmatpush3.bf16.msra.mxu0 %v1268_v24 }
 0x577   : > { %2389 = vmatprep.subr.bf16.mxu0 %v1267_v2 }
 0x57a   : > { %2390 = vmatpush3.bf16.msra.mxu0 %v1267_v2 }
 0x57b   : > { %2391 = vmatprep.subr.bf16.mxu0 %v1266_v30 }
 0x57e   : > { %2392 = vmatpush3.bf16.msra.mxu0 %v1266_v30 }
 0x581   : > { %2394 = vmatmul.mubr.msk.bf16.vlgmr.msra.gmra.mxu0 %vm359_vm0, %v3031_v35 }
 0x5c3   : > { %v1231_v48 = vpop.permute.xlu1 %1230 }
 0x5c4   : > { %v3395_v29 = vsel %vm467_vm2, %v1216_v31, %v1231_v48 }
 0x5c5   : > { %v1352_v35 = vsel %vm1349_vm4, %v3395_v29, %v2555_v3 }
 0x5c7   : > { %v1233_v58 = vpop.permute.xlu0 %1232 }
 0x5c8   : > { %v3398_v1 = vsel %vm467_vm2, %v1217_v0, %v1233_v58 }
 0x5c9   : > { %v1353_v34 = vsel %vm1349_vm4, %v3398_v1, %v2556_v23  ;;  %v1229_v40 = vpop.permute.xlu1 %1228 }
 0x5ca   : > { %v1355_v6 = vpack.c.bf16 %v1353_v34, %v1352_v35  ;;  %v3409_v24 = vsel %vm467_vm2, %v1215_v21, %v1229_v40 }
 0x5cb   : > { %v1227_v59 = vpop.permute.xlu0 %1226 }
 0x5cc   : > { %2397 = vmatprep.subr.bf16.mxu1 %v1355_v6  ;;  %v3412_v2 = vsel %vm467_vm2, %v1214_v7, %v1227_v59 }
 0x5cd   : > { %2398 = vmatpush3.bf16.msra.mxu1 %v1355_v6 }
 0x5cf   : > { %v2559_v15 = vpop.permute.xlu0 %2558 }
 0x5d0   : > { %v2561_v37 = vunpack.i.h.bf16 %v2559_v15  ;;  %v2560_v20 = vunpack.i.l.bf16 %v2559_v15  ;;  %v1254_v15 = vmax.f32 %v3329_v45, %v3337_v50 }
 0x5d2   : > { %v1350_v30 = vsel %vm1349_vm4, %v3412_v2, %v2560_v20  ;;  %v1351_v5 = vsel %vm1349_vm4, %v3409_v24, %v2561_v37  ;;  %v1257_v37 = vmax.f32 %v3305_v32, %v3311_v52  ;;  %v1261_v20 = vsel %vm310_vm3, %v3305_v32, %v3376_v27 }
 0x5d3   : > { %v1354_v48 = vpack.c.bf16 %v1351_v5, %v1350_v30  ;;  %v1258_v30 = vsel %vm310_vm3, %v3329_v45, %v3381_v19 }
 0x5d5   : > { %2399 = vmatprep.subr.bf16.mxu1 %v1354_v48 }
 0x5d6   : > { %2400 = vmatpush3.bf16.msra.mxu1 %v1354_v48  ;;  %v1255_v48 = vmax.f32 %v3334_v4, %v3340_v49 }
 0x5d9   : > { %2402 = vmatmul.mubr.msk.bf16.vlgmr.msra.gmra.mxu1 %vm526_vm1, %v3064_v53 }
 0x5da   : > { %2405 = vmatprep.mubr.msk.bf16.mxu1 %vm526_vm1, %v3069_v54 }
 0x5e1   : > { %2406 = vmatmul.mubr.msk.bf16.gmra.mxu1 %vm526_vm1, %v3078_v55 }
 0x5e2   : > { %2413 = vmatprep.mubr.msk.bf16.mxu1 %vm526_vm1, %v3144_v60 }
 0x629   : > { %v2371_v11 = vpop.f32.mrf.mxu0 }
 0x62a   : > { %v1068_v23 = vadd.f32 %v2371_v11, %v3045_v38  ;;  %v1259_v11 = vsel %vm310_vm3, %v3334_v4, %v3384_v16 }
 0x62b   : > { %v1051_v12 = vpop.f32.mrf.mxu0  ;;  %v1263_v61 = vmax.f32 %v1255_v48, %v1259_v11 }
 0x62c   : > { %v1066_v9 = vadd.f32 %v1051_v12, %v3053_v46  ;;  %v1130_v58 = vsel %vm467_vm2, %v1068_v23, 0.0 }
 0x62d   : > { %v2372_v8 = vpop.f32.mrf.mxu0 }
 0x62e   : > { %v1127_v53 = vsel %vm467_vm2, %v1066_v9, 0.0  ;;  %v1069_v54 = vadd.f32 %v2372_v8, %v3047_v39  ;;  %v1260_v39 = vsel %vm310_vm3, %v3302_v44, %v3373_v42 }
 0x62f   : > { %v1054_v31 = vpop.f32.mrf.mxu0 }
 0x630   : > { %v1067_v3 = vadd.f32 %v1054_v31, %v3055_v47  ;;  %v1132_v35 = vsel %vm467_vm2, %v1069_v54, 0.0  ;;  %v1256_v47 = vmax.f32 %v3302_v44, %v3308_v36 }
 0x632   : > { %v1128_v0 = vsel %vm467_vm2, %v1067_v3, 0.0  ;;  %v1264_v8 = vmax.f32 %v1256_v47, %v1260_v39 }
 0x633   : > { %v1129_v55 = vadd.f32 %v1128_v0, %v1127_v53  ;;  %v1262_v53 = vmax.f32 %v1254_v15, %v1258_v30  ;;  %v1265_v0 = vmax.f32 %v1257_v37, %v1261_v20 }
 0x635   : > { %v1131_v60 = vadd.f32 %v1130_v58, %v1129_v55 }
 0x637   : > { %v1133_v34 = vadd.f32 %v1132_v35, %v1131_v60 }
 0x639   : > { %v1134_v6 = vrot.slane %v1133_v34, 4 }
 0x63b   : > { %v1135_v46 = vadd.f32 %v1134_v6, %v1133_v34 }
 0x63d   : > { %v1136_v59 = vrot.slane %v1135_v46, 2 }
 0x63f   : > { %v1137_v40 = vadd.f32 %v1136_v59, %v1135_v46 }
 0x641   : > { %v1138_v38 = vrot.slane %v1137_v40, 1  ;;  %v2395_v7 = vpop.f32.mrf.mxu0 }
 0x642   : > { %v1315_v21 = vadd.f32 %v2395_v7, %v3082_v56 }
 0x643   : > { %v1139_v5 = vadd.f32 %v1138_v38, %v1137_v40  ;;  %v1306_v42 = vpop.f32.mrf.mxu0 }
 0x644   : > { %v1307_v56 = vadd.f32 %v1306_v42, %v3088_v62  ;;  %v1323_v31 = vadd.f32 %v1315_v21, %v3108_v14 }
 0x645   : > { %v1141_v12 = vmul.f32 0.03125, %v1139_v5  ;;  %v2396_v27 = vpop.f32.mrf.mxu0 }
 0x646   : > { %v1318_v19 = vadd.f32 %v2396_v27, %v3084_v57  ;;  %v1321_v34 = vadd.f32 %v1307_v56, %v3131_v43  ;;  %v1327_v14 = vadd.f32 %v1323_v31, %v1264_v8 }
 0x647   : > { %v1143_v55 = vsub.f32 %v1067_v3, %v1141_v12  ;;  %v1144_v58 = vsub.f32 %v1068_v23, %v1141_v12  ;;  %v1145_v62 = vsub.f32 %v1069_v54, %v1141_v12  ;;  %v1309_v60 = vpop.f32.mrf.mxu0  ;;  %v1142_v35 = vsub.f32 %v1066_v9, %v1141_v12 }
 0x648   : > { %v1324_v6 = vadd.f32 %v1318_v19, %v3127_v26  ;;  %v1310_v16 = vadd.f32 %v1309_v60, %v3090_v63  ;;  %v1325_v9 = vadd.f32 %v1321_v34, %v1262_v53 }
 0x649   : > { %v1147_v46 = vmul.f32 %v1143_v55, %v1143_v55  ;;  %v1146_v59 = vmul.f32 %v1142_v35, %v1142_v35  ;;  %v1148_v40 = vmul.f32 %v1144_v58, %v1144_v58  ;;  %v1149_v23 = vmul.f32 %v1145_v62, %v1145_v62 }
 0x64a   : > { %v1328_v38 = vadd.f32 %v1324_v6, %v1265_v0  ;;  %v1322_v47 = vadd.f32 %v1310_v16, %v3138_v51 }
 0x64b   : > { %v1151_v57 = vsel %vm467_vm2, %v1147_v46, 0.0  ;;  %v1150_v3 = vsel %vm467_vm2, %v1146_v59, 0.0  ;;  %v1153_v26 = vsel %vm467_vm2, %v1148_v40, 0.0  ;;  %v1155_v21 = vsel %vm467_vm2, %v1149_v23, 0.0 }
 0x64c   : > { %v1326_v54 = vadd.f32 %v1322_v47, %v1263_v61  ;;  %v2562_v43 = vpack.i.bf16 %v1328_v38, %v1327_v14  ;;  %v1152_v7 = vadd.f32 %v1151_v57, %v1150_v3 }
 0x64e   : > { %2563 = vrot.lane.b32.xlu1 %v2562_v43, %s2770_s15  ;;  %v2567_v63 = vpack.i.bf16 %v1326_v54, %v1325_v9  ;;  %v1154_v39 = vadd.f32 %v1153_v26, %v1152_v7 }
 0x650   : > { %2568 = vrot.lane.b32.xlu0 %v2567_v63, %s2770_s15  ;;  %v1156_v51 = vadd.f32 %v1155_v21, %v1154_v39 }
 0x652   : > { %v1157_v15 = vrot.slane %v1156_v51, 4 }
 0x654   : > { %v1158_v37 = vadd.f32 %v1157_v15, %v1156_v51 }
 0x656   : > { %v1159_v20 = vrot.slane %v1158_v37, 2 }
 0x658   : > { %v1160_v30 = vadd.f32 %v1159_v20, %v1158_v37  ;;  %v3791_v20 = vld [vmem:[#allocation8_spill] sm:$0xff] }
 0x65a   : > { %v1161_v5 = vrot.slane %v1160_v30, 1 }
 0x65c   : > { %v1162_v42 = vadd.f32 %v1161_v5, %v1160_v30  ;;  %v3792_v30 = vld [vmem:[#allocation9_spill] sm:$0xff] }
 0x65e   : > { %v1163_v56 = vmul.f32 0.03125, %v1162_v42 }
 0x660   : > { %v1164_v48 = vadd.f32 1e-06, %v1163_v56 }
 0x662   : > { %2622 = vrsqrt.f32 %v1164_v48 }
 0x66f   : > { %v2623_v11 = vpop.eup %2622 }
 0x670   : > { %v3472_v12 = vmul.f32 %v2623_v11, %v1142_v35  ;;  %v3474_v8 = vmul.f32 %v2623_v11, %v1144_v58  ;;  %v3476_v27 = vmul.f32 %v2623_v11, %v1143_v55  ;;  %v3478_v31 = vmul.f32 %v2623_v11, %v1145_v62 }
 0x699   : > { %v2403_v53 = vpop.f32.mrf.mxu1 }
 0x69a   : > { %v1399_v23 = vadd.f32 %v2403_v53, %v3158_v13 }
 0x69b   : > { %v1390_v0 = vpop.f32.mrf.mxu1 }
 0x69c   : > { %v1391_v3 = vadd.f32 %v1390_v0, %v3160_v18 }
 0x69d   : > { %v2404_v19 = vpop.f32.mrf.mxu1 }
 0x69e   : > { %v1429_v26 = vadd.f32 %v1391_v3, %v3412_v2 }
 0x69f   : > { %v1393_v60 = vpop.f32.mrf.mxu1 }
 0x6a1   : > { %v2407_v34 = vpop.f32.mrf.mxu1 }
 0x6a2   : > { %v3481_v61 = vadd.f32 %v2407_v34, %v3198_v33 }
 0x6a3   : > { %v1406_v6 = vpop.f32.mrf.mxu1 }
 0x6a4   : > { %v1407_v46 = vadd.f32 %v1406_v6, %v3188_v17  ;;  %v1425_v55 = vadd.f32 %v3481_v61, %v3198_v33  ;;  %v3794_v6 = vld [vmem:[#allocation10_spill] sm:$0xff] }
 0x6a5   : > { %v2408_v16 = vpop.f32.mrf.mxu1 }
 0x6a6   : > { %v3485_v35 = vadd.f32 %v2408_v16, %v3208_v41  ;;  %v1423_v14 = vadd.f32 %v1407_v46, %v3188_v17  ;;  %v1394_v17 = vadd.f32 %v1393_v60, %v3164_v28  ;;  %v3793_v60 = vld [vmem:[#allocation12_spill] sm:$0xff] }
 0x6a7   : > { %v1409_v58 = vpop.f32.mrf.mxu1 }
 0x6a8   : > { %v1422_v62 = vpack.c.bf16 %v3485_v35, %v3481_v61  ;;  %v1426_v59 = vadd.f32 %v3485_v35, %v3208_v41  ;;  %v1410_v40 = vadd.f32 %v1409_v58, %v3193_v25  ;;  %v1402_v41 = vadd.f32 %v2404_v19, %v3162_v22 }
 0x6a9   : > { %v1430_v63 = vadd.f32 %v1394_v17, %v3409_v24  ;;  %v3799_v17 = vld [vmem:[#allocation17_spill] sm:$0xff] }
 0x6aa   : > { %v1421_v38 = vpack.c.bf16 %v1410_v40, %v1407_v46  ;;  %v1424_v47 = vadd.f32 %v1410_v40, %v3193_v25  ;;  %v1428_v57 = vpack.c.bf16 %v1426_v59, %v1425_v55  ;;  %v1431_v25 = vadd.f32 %v1399_v23, %v3395_v29  ;;  %v3795_v46 = vld [vmem:[#allocation11_spill] sm:$0xff]  ;;  %v3796_v59 = vld [vmem:[#allocation13_spill] sm:$0xff] }
 0x6ab   : > { %v1432_v54 = vadd.f32 %v1402_v41, %v3398_v1 }
 0x6ac   : > { %1643 = vrot.lane.b32.xlu0 %v1428_v57, %s2771_s26  ;;  %2425 = vmatprep.mubr.msk.bf16.mxu0 %vm1349_vm4, %v1421_v38  ;;  %v1427_v33 = vpack.c.bf16 %v1424_v47, %v1423_v14  ;;  %v3797_v47 = vld [vmem:[#allocation14_spill] sm:$0xff] }
 0x6ae   : > { %1641 = vrot.lane.b32.xlu1 %v1427_v33, %s2771_s26  ;;  %v3798_v33 = vld [vmem:[#allocation15_spill] sm:$0xff] }
 0x6c0   : > { %v2564_v9 = vpop.permute.xlu1 %2563 }
 0x6c1   : > { %v2566_v43 = vunpack.i.h.bf16 %v2564_v9  ;;  %v2565_v7 = vunpack.i.l.bf16 %v2564_v9 }
 0x6c2   : > { %v2569_v39 = vpop.permute.xlu0 %2568 }
 0x6c3   : > { %v2571_v21 = vunpack.i.h.bf16 %v2569_v39  ;;  %v2570_v13 = vunpack.i.l.bf16 %v2569_v39  ;;  %v1451_v22 = vsel %vm1349_vm4, %v1431_v25, %v2565_v7  ;;  %v1452_v18 = vsel %vm1349_vm4, %v1432_v54, %v2566_v43  ;;  %v3800_v25 = vld [vmem:[#allocation16_spill] sm:$0xff] }
 0x6c4   : > { %v1454_v51 = vpack.c.bf16 %v1452_v18, %v1451_v22 }
 0x6c5   : > { %v1449_v28 = vsel %vm1349_vm4, %v1429_v26, %v2570_v13  ;;  %v1450_v15 = vsel %vm1349_vm4, %v1430_v63, %v2571_v21 }
 0x6c6   : > { %2409 = vmatprep.subr.bf16.mxu1 %v1454_v51  ;;  %v1453_v37 = vpack.c.bf16 %v1450_v15, %v1449_v28 }
 0x6c7   : > { %2410 = vmatpush3.bf16.msra.mxu1 %v1454_v51 }
 0x6c8   : > { %2411 = vmatprep.subr.bf16.mxu1 %v1453_v37 }
 0x6cb   : > { %2412 = vmatpush3.bf16.msra.mxu1 %v1453_v37 }
 0x6ce   : > { %2414 = vmatmul.mubr.msk.bf16.vlgmr.msra.gmra.mxu1 %vm526_vm1, %v3181_v10 }
 0x6cf   : > { %2417 = vmatprep.mubr.msk.bf16.mxu1 %vm526_vm1, %v3791_v20 }
 0x6d6   : > { %2418 = vmatmul.mubr.msk.bf16.gmra.mxu1 %vm526_vm1, %v3792_v30 }
 0x71e   : > { %v1644_v43 = vpop.permute.xlu0 %1643 }
 0x720   : > { %v1642_v5 = vpop.permute.xlu1 %1641 }
 0x721   : > { %2433 = vmatprep.mubr.msk.bf16.mxu1 %vm1349_vm4, %v1642_v5 }
 0x78e   : > { %v2415_v42 = vpop.f32.mrf.mxu1 }
 0x78f   : > { %v1498_v23 = vadd.f32 %v2415_v42, %v3798_v33 }
 0x790   : > { %v1489_v56 = vpop.f32.mrf.mxu1 }
 0x791   : > { %v1490_v54 = vadd.f32 %v1489_v56, %v3800_v25 }
 0x792   : > { %v2416_v48 = vpop.f32.mrf.mxu1 }
 0x793   : > { %v1501_v57 = vadd.f32 %v2416_v48, %v3797_v47 }
 0x794   : > { %v1492_v11 = vpop.f32.mrf.mxu1 }
 0x795   : > { %v3529_v41 = vpack.c.bf16 %v1501_v57, %v1498_v23  ;;  %v1493_v9 = vadd.f32 %v1492_v11, %v3799_v17 }
 0x796   : > { %v2419_v53 = vpop.f32.mrf.mxu1 }
 0x797   : > { %v1514_v34 = vadd.f32 %v2419_v53, %v3793_v60  ;;  %v3535_v7 = vpack.c.bf16 %v1493_v9, %v1490_v54 }
 0x798   : > { %v1505_v0 = vpop.f32.mrf.mxu1 }
 0x799   : > { %v1506_v58 = vadd.f32 %v1505_v0, %v3795_v46 }
 0x79a   : > { %v2420_v19 = vpop.f32.mrf.mxu1 }
 0x79b   : > { %v1517_v10 = vadd.f32 %v2420_v19, %v3794_v6 }
 0x79c   : > { %v1508_v16 = vpop.f32.mrf.mxu1 }
 0x79d   : > { %v1523_v55 = vpack.c.bf16 %v1517_v10, %v1514_v34  ;;  %v1509_v40 = vadd.f32 %v1508_v16, %v3796_v59 }
 0x79f   : > { %v1522_v14 = vpack.c.bf16 %v1509_v40, %v1506_v58  ;;  %1528 = vrot.lane.b32.xlu1 %v1523_v55, %s2771_s26  ;;  %2459 = vmatprep.subr.msk.bf16.mxu1 %vm1349_vm4, %v1523_v55  ;;  %v1655_v38 = vsel %vm1349_vm4, %v1523_v55, 0 }
 0x7a0   : > { %2430 = vmatpush3.bf16.xpose.msra.mxu1 %v1655_v38 }
 0x7a1   : > { %1526 = vrot.lane.b32.xlu0 %v1522_v14, %s2771_s26  ;;  %2460 = vmatprep.subr.msk.bf16.mxu1 %vm1349_vm4, %v1522_v14  ;;  %v1652_v3 = vsel %vm1349_vm4, %v1522_v14, 0 }
 0x7a8   : > { %2432 = vmatpush3.bf16.xpose.msra.mxu1 %v1652_v3 }
 0x7a9   : > { %2445 = vmatprep.subr.bf16.mxu1 %v3529_v41 }
 0x7af   : > { %2434 = vmatmul.mubr.msk.bf16.vlgmr.msra.gmra.mxu1 %vm1349_vm4, %v1644_v43 }
 0x7b0   : > { %2446 = vmatpush3.bf16.msra.mxu1 %v3529_v41 }
 0x7b1   : > { %2447 = vmatprep.subr.bf16.mxu1 %v3535_v7 }
 0x7b4   : > { %2448 = vmatpush3.bf16.msra.mxu1 %v3535_v7 }
 0x811   : > { %v1529_v26 = vpop.permute.xlu1 %1528 }
 0x812   : > { %v1540_v63 = vsel %vm1349_vm4, %v1529_v26, 0  ;;  %2457 = vmatprep.subr.msk.bf16.mxu0 %vm1349_vm4, %v1529_v26 }
 0x813   : > { %2422 = vmatpush3.bf16.xpose.msra.mxu0 %v1540_v63  ;;  %v1527_v39 = vpop.permute.xlu0 %1526 }
 0x814   : > { %2458 = vmatprep.subr.msk.bf16.mxu0 %vm1349_vm4, %v1527_v39  ;;  %v1537_v21 = vsel %vm1349_vm4, %v1527_v39, 0 }
 0x81b   : > { %2424 = vmatpush3.bf16.xpose.msra.mxu0 %v1537_v21 }
 0x822   : > { %2426 = vmatmul.mubr.msk.bf16.vlgmr.msra.gmra.mxu0 %vm1349_vm4, %v1422_v62 }
 0x86f   : > { %v2435_v13 = vpop.f32.mrf.mxu1 }
 0x870   : > { %v1708_v30 = vmul.f32 0.17677669, %v2435_v13 }
 0x871   : > { %v1691_v22 = vpop.f32.mrf.mxu1 }
 0x872   : > { %v1706_v18 = vmul.f32 0.17677669, %v1691_v22  ;;  %v1716_v61 = vsel %vm526_vm1, %v1708_v30, -inf }
 0x873   : > { %v2436_v51 = vpop.f32.mrf.mxu1 }
 0x874   : > { %v1709_v28 = vmul.f32 0.17677669, %v2436_v51  ;;  %v1710_v15 = vsel %vm526_vm1, %v1706_v18, -inf }
 0x875   : > { %1711 = vmax.xlane.f32.xlu1 %v1710_v15  ;;  %v1694_v37 = vpop.f32.mrf.mxu1 }
 0x876   : > { %v1707_v20 = vmul.f32 0.17677669, %v1694_v37  ;;  %v1719_v5 = vsel %vm526_vm1, %v1709_v28, -inf }
 0x878   : > { %v1713_v42 = vsel %vm526_vm1, %v1707_v20, -inf }
 0x879   : > { %1720 = vmax.xlane.f32.xlu1 %v1719_v5  ;;  %1714 = vmax.xlane.f32.xlu0 %v1713_v42 }
 0x87d   : > { %1717 = vmax.xlane.f32.xlu0 %v1716_v61 }
 0x8e2   : > { %v2427_v35 = vpop.f32.mrf.mxu0 }
 0x8e3   : > { %v1593_v11 = vmul.f32 0.17677669, %v2427_v35 }
 0x8e4   : > { %v1576_v62 = vpop.f32.mrf.mxu0 }
 0x8e5   : > { %v1591_v56 = vmul.f32 0.17677669, %v1576_v62  ;;  %v1601_v6 = vsel %vm526_vm1, %v1593_v11, -inf }
 0x8e6   : > { %v2428_v48 = vpop.f32.mrf.mxu0 }
 0x8e7   : > { %v1595_v53 = vsel %vm526_vm1, %v1591_v56, -inf  ;;  %v1594_v60 = vmul.f32 0.17677669, %v2428_v48 }
 0x8e8   : > { %v1579_v0 = vpop.f32.mrf.mxu0  ;;  %1596 = vmax.xlane.f32.xlu0 %v1595_v53 }
 0x8e9   : > { %v1592_v19 = vmul.f32 0.17677669, %v1579_v0  ;;  %v1604_v10 = vsel %vm526_vm1, %v1594_v60, -inf }
 0x8eb   : > { %v1598_v34 = vsel %vm526_vm1, %v1592_v19, -inf }
 0x8ec   : > { %1599 = vmax.xlane.f32.xlu1 %v1598_v34  ;;  %1602 = vmax.xlane.f32.xlu0 %v1601_v6 }
 0x8f0   : > { %1605 = vmax.xlane.f32.xlu1 %v1604_v10 }
 0x8fe   : > { %v1712_v16 = vpop.xlane.xlu1 %1711 }
 0x8ff   : > { %v1722_v46 = vsub.f32 %v1706_v18, %v1712_v16 }
 0x901   : > { %v1726_v58 = vmul.f32 1.442695, %v1722_v46 }
 0x902   : > { %v1721_v55 = vpop.xlane.xlu1 %1720  ;;  %v1715_v59 = vpop.xlane.xlu0 %1714 }
 0x903   : > { %2624 = vpow2.f32 %v1726_v58  ;;  %v1725_v40 = vsub.f32 %v1709_v28, %v1721_v55  ;;  %v1723_v14 = vsub.f32 %v1707_v20, %v1715_v59 }
 0x905   : > { %v1728_v38 = vmul.f32 1.442695, %v1723_v14  ;;  %v1732_v47 = vmul.f32 1.442695, %v1725_v40 }
 0x906   : > { %v1718_v57 = vpop.xlane.xlu0 %1717 }
 0x907   : > { %v1724_v33 = vsub.f32 %v1708_v30, %v1718_v57  ;;  %2626 = vpow2.f32 %v1728_v38 }
 0x908   : > { %2628 = vpow2.f32 %v1732_v47 }
 0x909   : > { %v1730_v23 = vmul.f32 1.442695, %v1724_v33 }
 0x90b   : > { %2630 = vpow2.f32 %v1730_v23 }
 0x910   : > { %v2625_v3 = vpop.eup %2624 }
 0x911   : > { %v1734_v17 = vsel %vm526_vm1, %v2625_v3, 0.0 }
 0x912   : > { %1735 = vadd.xlane.f32.xlu0 %v1734_v17 }
 0x914   : > { %v2627_v9 = vpop.eup %2626 }
 0x915   : > { %v1737_v25 = vsel %vm526_vm1, %v2627_v9, 0.0  ;;  %v2629_v54 = vpop.eup %2628 }
 0x916   : > { %1738 = vadd.xlane.f32.xlu1 %v1737_v25  ;;  %v1743_v63 = vsel %vm526_vm1, %v2629_v54, 0.0 }
 0x918   : > { %v2631_v43 = vpop.eup %2630 }
 0x919   : > { %v1740_v26 = vsel %vm526_vm1, %v2631_v43, 0.0 }
 0x91a   : > { %1741 = vadd.xlane.f32.xlu0 %v1740_v26  ;;  %1744 = vadd.xlane.f32.xlu1 %v1743_v63 }
 0x971   : > { %v1597_v39 = vpop.xlane.xlu0 %1596 }
 0x972   : > { %v1607_v21 = vsub.f32 %v1591_v56, %v1597_v39 }
 0x974   : > { %v1611_v15 = vmul.f32 1.442695, %v1607_v21 }
 0x975   : > { %v1600_v13 = vpop.xlane.xlu1 %1599  ;;  %v1603_v22 = vpop.xlane.xlu0 %1602 }
 0x976   : > { %v1609_v18 = vsub.f32 %v1593_v11, %v1603_v22  ;;  %v1608_v51 = vsub.f32 %v1592_v19, %v1600_v13 }
 0x978   : > { %v1615_v28 = vmul.f32 1.442695, %v1609_v18  ;;  %v1613_v30 = vmul.f32 1.442695, %v1608_v51 }
 0x979   : > { %v1606_v37 = vpop.xlane.xlu1 %1605 }
 0x97a   : > { %v1610_v20 = vsub.f32 %v1594_v60, %v1606_v37  ;;  %2632 = vpow2.f32 %v1615_v28 }
 0x97b   : > { %2634 = vpow2.f32 %v1611_v15 }
 0x97c   : > { %v1617_v5 = vmul.f32 1.442695, %v1610_v20 }
 0x97e   : > { %2636 = vpow2.f32 %v1617_v5  ;;  %v2664_v5 = vld [vmem:[%s3762_s4 + $0x20] sm:$0xff] }
 0x97f   : > { %2638 = vpow2.f32 %v1613_v30 }
 0x987   : > { %v2633_v42 = vpop.eup %2632 }
 0x988   : > { %v1625_v61 = vsel %vm526_vm1, %v2633_v42, 0.0  ;;  %v2635_v35 = vpop.eup %2634 }
 0x989   : > { %1626 = vadd.xlane.f32.xlu0 %v1625_v61  ;;  %v1619_v11 = vsel %vm526_vm1, %v2635_v35, 0.0  ;;  %v2666_v61 = vld [vmem:[%s3762_s4 + $0x30] sm:$0xff] }
 0x98b   : > { %v2637_v62 = vpop.eup %2636 }
 0x98c   : > { %v1628_v56 = vsel %vm526_vm1, %v2637_v62, 0.0  ;;  %v2639_v48 = vpop.eup %2638 }
 0x98d   : > { %1629 = vadd.xlane.f32.xlu1 %v1628_v56  ;;  %1620 = vadd.xlane.f32.xlu0 %v1619_v11  ;;  %v1622_v53 = vsel %vm526_vm1, %v2639_v48, 0.0  ;;  %v2774_v56 = vmov 3  }
 0x991   : > { %1623 = vadd.xlane.f32.xlu1 %v1622_v53 }
 0x99b   : > { %v1736_v0 = vpop.xlane.xlu0 %1735 }
 0x99c   : > { %2640 = vrcp.f32 %v1736_v0 }
 0x99f   : > { %v1739_v19 = vpop.xlane.xlu1 %1738 }
 0x9a0   : > { %2642 = vrcp.f32 %v1739_v19 }
 0x9a2   : > { %1758 = vrot.lane.b32.xlu1 %v3535_v7, %s2771_s26  ;;  %v2772_v7 = vmov 5  }
 0x9a3   : > { %v1742_v60 = vpop.xlane.xlu0 %1741  ;;  %v1745_v34 = vpop.xlane.xlu1 %1744  ;;  %1760 = vrot.lane.b32.xlu0 %v3529_v41, %s2771_s26  ;;  %2572 = vset.pattern.permute.xlu1 %v2772_v7 }
 0x9a4   : > { %2644 = vrcp.f32 %v1742_v60  ;;  %2573 = vset.pattern.permute.xlu0 %v2772_v7 }
 0x9a5   : > { %2646 = vrcp.f32 %v1745_v34 }
 0x9a9   : > { %v2641_v6 = vpop.eup %2640 }
 0x9aa   : > { %v1750_v16 = vmul.f32 %v2641_v6, %v2625_v3 }
 0x9ad   : > { %v2643_v10 = vpop.eup %2642 }
 0x9ae   : > { %v1751_v46 = vmul.f32 %v2643_v10, %v2627_v9 }
 0x9b0   : > { %v1823_v55 = vpack.c.bf16 %v1751_v46, %v1750_v16 }
 0x9b1   : > { %v2645_v58 = vpop.eup %2644 }
 0x9b2   : > { %v2647_v59 = vpop.eup %2646  ;;  %v1752_v40 = vmul.f32 %v2645_v58, %v2631_v43  ;;  %2449 = vmatprep.mubr.msk.bf16.mxu1 %vm526_vm1, %v1823_v55 }
 0x9b3   : > { %v1753_v14 = vmul.f32 %v2647_v59, %v2629_v54 }
 0x9b5   : > { %v1824_v38 = vpack.c.bf16 %v1753_v14, %v1752_v40 }
 0x9b7   : > { %2450 = vmatmul.mubr.msk.bf16.vlgmr.msra.gmra.mxu1 %vm526_vm1, %v1824_v38 }
 0xa12   : > { %v1627_v41 = vpop.xlane.xlu0 %1626 }
 0xa16   : > { %v1630_v47 = vpop.xlane.xlu1 %1629  ;;  %v1621_v57 = vpop.xlane.xlu0 %1620 }
 0xa17   : > { %2648 = vrcp.f32 %v1630_v47 }
 0xa18   : > { %2650 = vrcp.f32 %v1621_v57 }
 0xa19   : > { %2652 = vrcp.f32 %v1627_v41 }
 0xa1a   : > { %v1624_v33 = vpop.xlane.xlu1 %1623  ;;  %v1761_v23 = vpop.permute.xlu0 %1760 }
 0xa1b   : > { %2654 = vrcp.f32 %v1624_v33  ;;  %2437 = vmatprep.subr.bf16.mxu0 %v1761_v23 }
 0xa1c   : > { %2438 = vmatpush3.bf16.msra.mxu0 %v1761_v23 }
 0xa1e   : > { %v1759_v3 = vpop.permute.xlu1 %1758 }
 0xa1f   : > { %2439 = vmatprep.subr.bf16.mxu0 %v1759_v3 }
 0xa20   : > { %2440 = vmatpush3.bf16.msra.mxu0 %v1759_v3 }
 0xa24   : > { %v2649_v17 = vpop.eup %2648 }
 0xa25   : > { %v2651_v9 = vpop.eup %2650  ;;  %v1638_v43 = vmul.f32 %v2649_v17, %v2637_v62  ;;  %v2773_v62 = vmov 4  }
 0xa26   : > { %v2653_v25 = vpop.eup %2652  ;;  %v1635_v26 = vmul.f32 %v2651_v9, %v2635_v35  ;;  %v2667_v35 = vld [vmem:[%s3762_s4 + $0x38] sm:$0xff] }
 0xa27   : > { %v1637_v39 = vmul.f32 %v2653_v25, %v2633_v42  ;;  %v2665_v42 = vld [vmem:[%s3762_s4 + $0x28] sm:$0xff] }
 0xa28   : > { %v2655_v54 = vpop.eup %2654 }
 0xa29   : > { %v1636_v63 = vmul.f32 %v2655_v54, %v2639_v48  ;;  %v1755_v13 = vpack.c.bf16 %v1638_v43, %v1637_v39 }
 0xa2b   : > { %v1754_v21 = vpack.c.bf16 %v1636_v63, %v1635_v26 }
 0xa2d   : > { %2441 = vmatprep.mubr.msk.bf16.mxu0 %vm526_vm1, %v1754_v21 }
 0xa2e   : > { %2442 = vmatmul.mubr.msk.bf16.vlgmr.msra.gmra.mxu0 %vm526_vm1, %v1755_v13 }
 0xa77   : > { %v2451_v22 = vpop.f32.mrf.mxu1 }
 0xa78   : > { %v1972_v37 = vadd.f32 %v2451_v22, %v3308_v36  ;;  %v2661_v36 = vld [vmem:[%s3762_s4 + $0x10] sm:$0xff]  ;;  %v1968_v19 = vadd.f32 %v2451_v22, %v3302_v44 }
 0xa79   : > { %v1865_v18 = vpop.f32.mrf.mxu1 }
 0xa7a   : > { %v1970_v51 = vadd.f32 %v1865_v18, %v3337_v50  ;;  %v2660_v50 = vld [vmem:[%s3762_s4] sm:$0xff]  ;;  %v1966_v53 = vadd.f32 %v1865_v18, %v3329_v45 }
 0xa7b   : > { %v3574_v28 = vpop.f32.mrf.mxu1 }
 0xa7c   : > { %1978 = vrot.lane.b32.xlu1 %v1970_v51, %s2770_s15  ;;  %v1973_v30 = vadd.f32 %v3574_v28, %v3311_v52  ;;  %v2663_v52 = vld [vmem:[%s3762_s4 + $0x18] sm:$0xff]  ;;  %v1969_v44 = vadd.f32 %v3574_v28, %v3305_v32 }
 0xa7d   : > { %v1868_v15 = vpop.f32.mrf.mxu1 }
 0xa7e   : > { %v1971_v20 = vadd.f32 %v1868_v15, %v3340_v49  ;;  %v2662_v49 = vld [vmem:[%s3762_s4 + $0x8] sm:$0xff]  ;;  %v1967_v60 = vadd.f32 %v1868_v15, %v3334_v4 }
 0xa80   : > { %1982 = vrot.lane.b32.xlu1 %v1972_v37, %s2770_s15  ;;  %1980 = vrot.lane.b32.xlu0 %v1971_v20, %s2770_s15 }
 0xa84   : > { %1171 = vperm.xlu1 %2572, %v2660_v50   ;;  %1984 = vrot.lane.b32.xlu0 %v1973_v30, %s2770_s15 }
 0xa88   : > { %1179 = vperm.xlu1 %2572, %v2661_v36   ;;  %1175 = vperm.xlu0 %2573, %v2662_v49  }
 0xa8c   : > { %1183 = vperm.xlu1 %2572, %v2663_v52   ;;  %1191 = vperm.xlu0 %2573, %v2664_v5  }
 0xa90   : > { %1195 = vperm.xlu1 %2572, %v2665_v42   ;;  %1199 = vperm.xlu0 %2573, %v2666_v61  }
 0xa94   : > { %1203 = vperm.xlu1 %2572, %v2667_v35   ;;  %2574 = vset.pattern.permute.xlu0 %v2773_v62 }
 0xa95   : > { %1923 = vperm.xlu0 %2574, %v2660_v50  }
 0xa98   : > { %2575 = vset.pattern.permute.xlu1 %v2773_v62 }
 0xa99   : > { %1927 = vperm.xlu1 %2575, %v2662_v49   ;;  %1935 = vperm.xlu0 %2574, %v2663_v52  }
 0xa9d   : > { %1931 = vperm.xlu1 %2575, %v2661_v36   ;;  %1943 = vperm.xlu0 %2574, %v2664_v5  }
 0xaa1   : > { %2576 = vset.pattern.permute.xlu1 %v2774_v56  ;;  %1955 = vperm.xlu0 %2574, %v2667_v35  }
 0xaa2   : > { %2038 = vperm.xlu1 %2576, %v2660_v50  }
 0xaa5   : > { %2578 = vset.pattern.permute.xlu0 %v2774_v56 }
 0xaa6   : > { %2046 = vperm.xlu1 %2576, %v2661_v36   ;;  %2042 = vperm.xlu0 %2578, %v2662_v49  }
 0xaaa   : > { %2050 = vperm.xlu1 %2576, %v2663_v52   ;;  %2062 = vperm.xlu0 %2578, %v2665_v42  }
 0xaae   : > { %2577 = vset.pattern.permute.xlu1 %v2773_v62 }
 0xaaf   : > { %1947 = vperm.xlu1 %2577, %v2665_v42  }
 0xab3   : > { %1951 = vperm.xlu1 %2577, %v2666_v61  }
 0xab7   : > { %2579 = vset.pattern.permute.xlu1 %v2774_v56 }
 0xab8   : > { %2058 = vperm.xlu1 %2579, %v2664_v5  }
 0xabc   : > { %2066 = vperm.xlu1 %2579, %v2666_v61  }
 0xac0   : > { %2070 = vperm.xlu1 %2579, %v2667_v35  }
 0xaee   : > { %v1979_v48 = vpop.permute.xlu1 %1978  ;;  %v2443_v11 = vpop.f32.mrf.mxu0 }
 0xaef   : > { %v1990_v34 = vsel %vm1349_vm4, %v1966_v53, %v1979_v48  ;;  %v1821_v14 = vadd.f32 %v2443_v11, %v3395_v29 }
 0xaf0   : > { %v1804_v0 = vpop.f32.mrf.mxu0  ;;  %v1995_v55 = vsel %vm1994_vm5, %v1990_v34, 0.0 }
 0xaf1   : > { %v1819_v59 = vadd.f32 %v1804_v0, %v3412_v2  ;;  %v1883_v29 = vsel %vm1349_vm4, %v1821_v14, 0.0 }
 0xaf2   : > { %v1983_v6 = vpop.permute.xlu1 %1982  ;;  %v1981_v10 = vpop.permute.xlu0 %1980 }
 0xaf3   : > { %v1992_v16 = vsel %vm1349_vm4, %v1968_v19, %v1983_v6  ;;  %v1991_v46 = vsel %vm1349_vm4, %v1967_v60, %v1981_v10  ;;  %v2444_v58 = vpop.f32.mrf.mxu0  ;;  %v1880_v33 = vsel %vm1349_vm4, %v1819_v59, 0.0 }
 0xaf4   : > { %v1996_v45 = vsel %vm1994_vm5, %v1991_v46, 0.0  ;;  %v1998_v38 = vsel %vm1994_vm5, %v1992_v16, 0.0  ;;  %v1822_v2 = vadd.f32 %v2444_v58, %v3398_v1 }
 0xaf5   : > { %v1997_v4 = vadd.f32 %v1996_v45, %v1995_v55  ;;  %v1807_v40 = vpop.f32.mrf.mxu0 }
 0xaf6   : > { %v1820_v7 = vadd.f32 %v1807_v40, %v3409_v24  ;;  %v1985_v41 = vpop.permute.xlu0 %1984  ;;  %v1885_v24 = vsel %vm1349_vm4, %v1822_v2, 0.0 }
 0xaf7   : > { %v1993_v47 = vsel %vm1349_vm4, %v1969_v44, %v1985_v41  ;;  %v1999_v57 = vadd.f32 %v1998_v38, %v1997_v4 }
 0xaf8   : > { %v1881_v23 = vsel %vm1349_vm4, %v1820_v7, 0.0  ;;  %v2000_v32 = vsel %vm1994_vm5, %v1993_v47, 0.0 }
 0xaf9   : > { %v1882_v3 = vadd.f32 %v1881_v23, %v1880_v33  ;;  %v2001_v17 = vadd.f32 %v2000_v32, %v1999_v57 }
 0xafb   : > { %v1884_v9 = vadd.f32 %v1883_v29, %v1882_v3  ;;  %v2002_v25 = vrot.slane %v2001_v17, 4 }
 0xafd   : > { %v1886_v54 = vadd.f32 %v1885_v24, %v1884_v9  ;;  %v2003_v43 = vadd.f32 %v2002_v25, %v2001_v17 }
 0xaff   : > { %v1887_v26 = vrot.slane %v1886_v54, 4  ;;  %v2004_v63 = vrot.slane %v2003_v43, 2  ;;  %v1172_v39 = vpop.permute.xlu1 %1171 }
 0xb00   : > { %v1186_v37 = vmul.f32 %v1172_v39, %v3472_v12 }
 0xb01   : > { %v1888_v21 = vadd.f32 %v1887_v26, %v1886_v54  ;;  %v2005_v1 = vadd.f32 %v2004_v63, %v2003_v43 }
 0xb03   : > { %v1889_v13 = vrot.slane %v1888_v21, 2  ;;  %v2006_v22 = vrot.slane %v2005_v1, 1  ;;  %v1180_v18 = vpop.permute.xlu1 %1179  ;;  %v1176_v51 = vpop.permute.xlu0 %1175 }
 0xb04   : > { %v1188_v35 = vmul.f32 %v1180_v18, %v3474_v8  ;;  %v1187_v62 = vmul.f32 %v1176_v51, %v3476_v27 }
 0xb05   : > { %v1890_v28 = vadd.f32 %v1889_v13, %v1888_v21  ;;  %v2007_v15 = vadd.f32 %v2006_v22, %v2005_v1 }
 0xb07   : > { %v1891_v20 = vrot.slane %v1890_v28, 1  ;;  %v2008_v30 = vmul.f32 0.03125, %v2007_v15  ;;  %v1184_v50 = vpop.permute.xlu1 %1183  ;;  %v1192_v36 = vpop.permute.xlu0 %1191 }
 0xb08   : > { %v1206_v49 = vadd.f32 %v1192_v36, %v1186_v37 }
 0xb09   : > { %v1892_v52 = vadd.f32 %v1891_v20, %v1890_v28  ;;  %v3631_v5 = vsub.f32 %v1991_v46, %v2008_v30  ;;  %v3633_v42 = vsub.f32 %v1992_v16, %v2008_v30  ;;  %v3635_v61 = vsub.f32 %v1993_v47, %v2008_v30 }
 0xb0a   : > { %1210 = vst.msk [vmem:[%s3639_s6 + $0x10] sm:$0xff] %vm467_vm2, %v1206_v49  ;;  %v3643_v12 = vsub.f32 %v1990_v34, %v2008_v30  ;;  %v1189_v16 = vmul.f32 %v1184_v50, %v3478_v31 }
 0xb0b   : > { %v1893_v56 = vmul.f32 0.03125, %v1892_v52  ;;  %v1196_v48 = vpop.permute.xlu1 %1195  ;;  %v1200_v11 = vpop.permute.xlu0 %1199  ;;  %v2014_v53 = vmul.f32 %v3631_v5, %v3631_v5  ;;  %v2015_v27 = vmul.f32 %v3633_v42, %v3633_v42  ;;  %v2016_v31 = vmul.f32 %v3635_v61, %v3635_v61 }
 0xb0c   : > { %v1207_v0 = vadd.f32 %v1196_v48, %v1187_v62  ;;  %v1208_v19 = vadd.f32 %v1200_v11, %v1188_v35  ;;  %v2013_v8 = vmul.f32 %v3643_v12, %v3643_v12 }
 0xb0d   : > { %v3651_v60 = vsub.f32 %v1819_v59, %v1893_v56  ;;  %v3653_v6 = vsub.f32 %v1820_v7, %v1893_v56  ;;  %v3655_v34 = vsub.f32 %v1821_v14, %v1893_v56  ;;  %v3657_v10 = vsub.f32 %v1822_v2, %v1893_v56 }
 0xb0e   : > { %1211 = vst.msk [vmem:[%s3639_s6 + $0x28] sm:$0xff] %vm467_vm2, %v1207_v0  ;;  %1212 = vst.msk [vmem:[%s3639_s6 + $0x40] sm:$0xff] %vm467_vm2, %v1208_v19  ;;  %v2017_v46 = vsel %vm1994_vm5, %v2013_v8, 0.0  ;;  %v2018_v58 = vsel %vm1994_vm5, %v2014_v53, 0.0  ;;  %v2020_v41 = vsel %vm1994_vm5, %v2015_v27, 0.0  ;;  %v2022_v2 = vsel %vm1994_vm5, %v2016_v31, 0.0 }
 0xb0f   : > { %v1898_v55 = vmul.f32 %v3651_v60, %v3651_v60  ;;  %v1899_v59 = vmul.f32 %v3653_v6, %v3653_v6  ;;  %v1900_v45 = vmul.f32 %v3655_v34, %v3655_v34  ;;  %v1204_v44 = vpop.permute.xlu1 %1203  ;;  %v2019_v40 = vadd.f32 %v2018_v58, %v2017_v46 }
 0xb10   : > { %v1209_v4 = vadd.f32 %v1204_v44, %v1189_v16  ;;  %v1901_v14 = vmul.f32 %v3657_v10, %v3657_v10  ;;  %v1924_v63 = vpop.permute.xlu0 %1923 }
 0xb11   : > { %v1902_v38 = vsel %vm1349_vm4, %v1898_v55, 0.0  ;;  %v1903_v7 = vsel %vm1349_vm4, %v1899_v59, 0.0  ;;  %v2021_v57 = vadd.f32 %v2020_v41, %v2019_v40  ;;  %v1905_v33 = vsel %vm1349_vm4, %v1900_v45, 0.0 }
 0xb12   : > { %v1904_v47 = vadd.f32 %v1903_v7, %v1902_v38  ;;  %1213 = vst.msk [vmem:[%s3639_s6 + $0x58] sm:$0xff] %vm467_vm2, %v1209_v4  ;;  %v1907_v17 = vsel %vm1349_vm4, %v1901_v14, 0.0 }
 0xb13   : > { %v2023_v3 = vadd.f32 %v2022_v2, %v2021_v57 }
 0xb14   : > { %v1906_v23 = vadd.f32 %v1905_v33, %v1904_v47  ;;  %v1928_v32 = vpop.permute.xlu1 %1927  ;;  %v1936_v28 = vpop.permute.xlu0 %1935 }
 0xb15   : > { %v2024_v9 = vrot.slane %v2023_v3, 4 }
 0xb16   : > { %v1908_v29 = vadd.f32 %v1907_v17, %v1906_v23 }
 0xb17   : > { %v2025_v54 = vadd.f32 %v2024_v9, %v2023_v3 }
 0xb18   : > { %v1909_v25 = vrot.slane %v1908_v29, 4  ;;  %v1932_v24 = vpop.permute.xlu1 %1931  ;;  %v1944_v52 = vpop.permute.xlu0 %1943 }
 0xb19   : > { %v2026_v26 = vrot.slane %v2025_v54, 2 }
 0xb1a   : > { %v1910_v43 = vadd.f32 %v1909_v25, %v1908_v29 }
 0xb1b   : > { %v2027_v21 = vadd.f32 %v2026_v26, %v2025_v54 }
 0xb1c   : > { %v1911_v39 = vrot.slane %v1910_v43, 2  ;;  %v1956_v62 = vpop.permute.xlu0 %1955 }
 0xb1d   : > { %v2039_v1 = vpop.permute.xlu1 %2038  ;;  %v2028_v22 = vrot.slane %v2027_v21, 1 }
 0xb1e   : > { %v1912_v13 = vadd.f32 %v1911_v39, %v1910_v43 }
 0xb1f   : > { %v2029_v51 = vadd.f32 %v2028_v22, %v2027_v21 }
 0xb20   : > { %v1913_v18 = vrot.slane %v1912_v13, 1 }
 0xb21   : > { %v2047_v15 = vpop.permute.xlu1 %2046  ;;  %v2030_v20 = vmul.f32 0.03125, %v2029_v51  ;;  %v2043_v48 = vpop.permute.xlu0 %2042 }
 0xb22   : > { %v1914_v37 = vadd.f32 %v1913_v18, %v1912_v13 }
 0xb23   : > { %v2031_v50 = vadd.f32 1e-06, %v2030_v20 }
 0xb24   : > { %v1915_v30 = vmul.f32 0.03125, %v1914_v37 }
 0xb25   : > { %v2051_v36 = vpop.permute.xlu1 %2050  ;;  %2656 = vrsqrt.f32 %v2031_v50  ;;  %v2063_v45 = vpop.permute.xlu0 %2062 }
 0xb26   : > { %v1916_v49 = vadd.f32 1e-06, %v1915_v30 }
 0xb28   : > { %2658 = vrsqrt.f32 %v1916_v49 }
 0xb2a   : > { %v1948_v35 = vpop.permute.xlu1 %1947 }
 0xb2e   : > { %v1952_v56 = vpop.permute.xlu1 %1951 }
 0xb32   : > { %v2657_v11 = vpop.eup %2656 }
 0xb33   : > { %v2059_v53 = vpop.permute.xlu1 %2058  ;;  %v2033_v0 = vmul.f32 %v2657_v11, %v3643_v12  ;;  %v2035_v19 = vmul.f32 %v2657_v11, %v3633_v42  ;;  %v2036_v8 = vmul.f32 %v2657_v11, %v3635_v61  ;;  %v2034_v27 = vmul.f32 %v2657_v11, %v3631_v5 }
 0xb35   : > { %v2659_v16 = vpop.eup %2658  ;;  %v2053_v55 = vmul.f32 %v2039_v1, %v2033_v0  ;;  %v2055_v31 = vmul.f32 %v2047_v15, %v2035_v19  ;;  %v2054_v12 = vmul.f32 %v2043_v48, %v2034_v27  ;;  %v2056_v14 = vmul.f32 %v2051_v36, %v2036_v8 }
 0xb36   : > { %v1919_v46 = vmul.f32 %v2659_v16, %v3653_v6  ;;  %v1920_v58 = vmul.f32 %v2659_v16, %v3655_v34  ;;  %v1918_v59 = vmul.f32 %v2659_v16, %v3651_v60  ;;  %v1921_v44 = vmul.f32 %v2659_v16, %v3657_v10 }
 0xb37   : > { %v2067_v42 = vpop.permute.xlu1 %2066  ;;  %v2073_v6 = vadd.f32 %v2059_v53, %v2053_v55  ;;  %v2074_v40 = vadd.f32 %v2063_v45, %v2054_v12 }
 0xb38   : > { %v1939_v5 = vmul.f32 %v1928_v32, %v1919_v46  ;;  %v1940_v61 = vmul.f32 %v1932_v24, %v1920_v58  ;;  %v1938_v4 = vmul.f32 %v1924_v63, %v1918_v59  ;;  %v1941_v34 = vmul.f32 %v1936_v28, %v1921_v44 }
 0xb39   : > { %v2075_v60 = vadd.f32 %v2067_v42, %v2055_v31  ;;  %2077 = vst.msk [vmem:[%s3639_s6] sm:$0xff] %vm1994_vm5, %v2073_v6  ;;  %2078 = vst.msk [vmem:[%s3639_s6 + $0x18] sm:$0xff] %vm1994_vm5, %v2074_v40 }
 0xb3a   : > { %v1958_v10 = vadd.f32 %v1944_v52, %v1938_v4  ;;  %v1959_v38 = vadd.f32 %v1948_v35, %v1939_v5  ;;  %v1960_v7 = vadd.f32 %v1952_v56, %v1940_v61  ;;  %v1961_v41 = vadd.f32 %v1956_v62, %v1941_v34 }
 0xb3b   : > { %2079 = vst.msk [vmem:[%s3639_s6 + $0x30] sm:$0xff] %vm1994_vm5, %v2075_v60  ;;  %v2071_v47 = vpop.permute.xlu1 %2070 }
 0xb3c   : > { %1962 = vst.msk [vmem:[%s3639_s6 + $0x8] sm:$0xff] %vm1349_vm4, %v1958_v10  ;;  %1963 = vst.msk [vmem:[%s3639_s6 + $0x20] sm:$0xff] %vm1349_vm4, %v1959_v38  ;;  %v2076_v57 = vadd.f32 %v2071_v47, %v2056_v14 }
 0xb3d   : > { %1964 = vst.msk [vmem:[%s3639_s6 + $0x38] sm:$0xff] %vm1349_vm4, %v1960_v7  ;;  %1965 = vst.msk [vmem:[%s3639_s6 + $0x50] sm:$0xff] %vm1349_vm4, %v1961_v41 }
 0xb3e   : > { %2080 = vst.msk [vmem:[%s3639_s6 + $0x48] sm:$0xff] %vm1994_vm5, %v2076_v57 }
 0xb3f   : > { %2709 = shalt.err (!%p2706_p0)
}
 0xb40   : > { %s2710_s14 = scalar_lea.hbm %s3703_s13, 1536  ;;  %s2714_s12 = scalar_lea.hbm %s3763_s5, 3072 }
 0xb41   : > { %p2711_p2 = scmp.ne.s32.totalorder %s3703_s13, %s2710_s14  ;;  %p2715_p3 = scmp.lt.s32.totalorder %s3703_s13, %s3763_s5 }
 0xb42   : > { %p2716_p6 = scmp.lt.s32.totalorder %s2714_s12, %s2710_s14 }
 0xb43   : > { %p2712_p9 = pnand %p2711_p2, %p3801_p13 }
 0xb44   : > { %p2717_p11 = por %p2716_p6, %p2715_p3 }
 0xb45   : > { %p2713_p1 = pneg %p2712_p9 }
 0xb47   : > { %p2718_p12 = pnand %p2717_p11, %p2713_p1 }
 0xb49   : > { %2721 = shalt.err (!%p2718_p12)
}
 0xb4a   : > { %s2776_s8 = smov 384   ;;  %s2777_s22 = smov 24  }
 0xb4b   : > { %2468 = dma.vmem_to_hbm [thread:$0]  (%p3801_p13), %s3711_s9, 1536, %s3703_s13, %s2082_s16, %s2776_s8, %s2776_s8, %s2777_s22  }
 0xb4c PF: > { %s2110_s10 = sand.u32 1, %s2748_s18   ;;  %p3802_p4 = scmp.ne.s32.totalorder %s3778_s30, 0 }
 0xb4d   : > { %p3803_p5 = scmp.ge.s32.totalorder %s2760_s21, 2  ;;  %s2111_s23 = scalar_lea.sflag [#allocation4], %s2110_s10 }
 0xb4f   : > { %p2475_p7 = pnand %p3803_p5, %p3802_p4 }
 0xb51   : > { %p2476_p8 = pneg %p2475_p7 }
 0xb53   : > { %2743 = dma.done.wait (%p2476_p8), %s2111_s23, 1536  }
 0xb54   : > { %2745 = vsyncadd (%p2476_p8), %s2111_s23, 4294965760  ;;  %p18_p10 = scmp.ge.s32.totalorder %s2833_s24, 4   ;;  %s3804_s18 = smov %s2752_s19 }
 0xb55   : > { %s3805_s19 = smov %s2756_s20  ;;  %s3806_s20 = smov %s2845_s27 }
 0xb56   : > { %s3807_s21 = smov %s2833_s24  ;;  %20 = sbr.rel (!%p18_p10) target bundleno = 5 (0x5), region = 88 }
 0xb5b   :  { %2116 = vsyncpa [#allocation3], 1 }
 0xb5c   :  { %2118 = vsyncpa [#allocation3 + $0x1], 1 }
 0xb5d   :  { %2119 = vsyncpa [#allocation4], 1 }
 0xb5e   :  { %2121 = vsyncpa [#allocation4 + $0x1], 1 }

</bundles_post_ra>
